<compile_context>
chip_gen: v7x
topology: tpu7x:2x2x1
jax: 0.10.0
libtpu: 0.0.40
codegen_flags: <defaults>
</compile_context>

<pallas_src>
import jax
import jax.numpy as jnp
from jax.experimental import pallas as pl
from jax.experimental.pallas import tpu as pltpu


def _leaky_relu(x, slope=0.2):
    return jnp.where(x > 0, x, slope * x)


def _disc_kernel(x_ref, w1_ref, b1_ref, w2_ref, b2_ref, w3_ref, b3_ref,
                 out_ref):
    # Features-in-lanes: activations are (Pb, B, H), lanes = feature dim.
    # x_ref : (B, 2)          f32  (resident across grid steps)
    # w1_ref: (Pb, 2, H1)     bf16   b1_ref: (Pb, 1, H1) f32
    # w2_ref: (Pb, H1, H2)    bf16   b2_ref: (Pb, 1, H2) f32
    # w3_ref: (Pb, 1, H2)     bf16   b3_ref: (Pb, 1, 1)  f32
    # out_ref: (1, Pb, B)     f32
    x = x_ref[...]                                        # (B, 2)
    d_in = x.shape[-1]                                    # static (== 2)
    w1 = w1_ref[...].astype(jnp.float32)                  # (Pb, 2, H1)  (tiny)

    # Layer 1: K=2 contraction as broadcast FMAs on the VPU (skip the MXU).
    h1 = b1_ref[...]                                      # (Pb, 1, H1)
    for d in range(d_in):                                 # static unroll
        h1 = h1 + x[:, d][None, :, None] * w1[:, d:d + 1, :]
    h1 = _leaky_relu(h1)                                  # (Pb, B, H1)

    # Layer 2: one batched bf16 x bf16 MXU matmul (f32 accumulate) for all Pb
    # folded paths.  Result lane dim is H2 = 256 -> full MXU width; W2 is never
    # expanded to f32 in VMEM.
    h2 = jnp.einsum("pbk,pkn->pbn", h1.astype(jnp.bfloat16), w2_ref[...],
                    preferred_element_type=jnp.float32)   # (Pb, B, H2)
    h2 = _leaky_relu(h2 + b2_ref[...])

    # Layer 3: N=1 output as VPU multiply + lane reduction (skip the MXU,
    # avoids a (H2,1) tile padded to (H2,128)).
    w3 = w3_ref[...].astype(jnp.float32)                  # (Pb, 1, H2)  (tiny)
    h3 = jnp.sum(h2 * w3, axis=-1)                        # (Pb, B)
    b3 = b3_ref[...]                                      # (Pb, 1, 1)
    y = jax.nn.sigmoid(h3 + b3[:, :, 0])                  # (Pb, B)
    out_ref[0] = y.astype(out_ref.dtype)


def _num_tensorcores():
    """TensorCores per chip that a 'parallel' grid axis can shard across."""
    try:
        kind = jax.devices()[0].device_kind.lower()
    except Exception:
        return 1
    return 2 if any(t in kind for t in ("v7", "v4")) else 1


def _divisors(n):
    return [d for d in range(1, n + 1) if n % d == 0]


def _pad_block_bytes(shape, itemsize):
    """Bytes a block occupies in VMEM with (8, 128) padding of the minor dims."""
    s = list(shape)
    s[-1] = -(-s[-1] // 128) * 128
    if len(s) >= 2:
        s[-2] = -(-s[-2] // 8) * 8
    n = 1
    for v in s:
        n *= v
    return n * itemsize


def _vmem_estimate(pb, batch, h1, h2, d_in):
    """Rough per-step VMEM footprint: double-buffered blocks + f32 activations."""
    blocks = [
        ((pb, d_in, h1), 2),   # W1 bf16
        ((pb, 1, h1), 4),      # b1 f32
        ((pb, h1, h2), 2),     # W2 bf16  (dominant)
        ((pb, 1, h2), 4),      # b2 f32
        ((pb, 1, h2), 2),      # W3 bf16
        ((pb, 1, 1), 4),       # b3 f32
        ((1, pb, batch), 4),   # out f32
        ((batch, d_in), 4),    # x f32
    ]
    dma = sum(2 * _pad_block_bytes(s, i) for s, i in blocks)
    acts = 2 * _pad_block_bytes((pb, batch, h1), 4) + \
           2 * _pad_block_bytes((pb, batch, h2), 4)
    return dma + acts


def _choose_path_block(n_paths, n_cores, batch, h1, h2, d_in,
                       cap=8, budget=40 << 20):
    """Largest divisor of n_paths <= cap that (a) leaves >= n_cores grid steps
    on multi-TensorCore chips (so the 'parallel' axis has work for each core)
    and (b) fits the per-step VMEM budget.  On single-TC chips (v5e/v6e) the
    grid is a sequential loop, so we take G = 1 whenever it fits."""
    divs = [d for d in _divisors(n_paths) if d <= cap] or [1]
    if n_cores > 1:
        multi = [d for d in divs if n_paths // d >= n_cores]
        if multi:
            divs = multi
    pb = max(divs)
    while pb > 1 and _vmem_estimate(pb, batch, h1, h2, d_in) > budget:
        smaller = [d for d in _divisors(n_paths) if d < pb]
        pb = max(smaller) if smaller else 1
    return pb


@jax.jit
def discriminator_forward(x, params):
    """x: (B, 2) f32.  params: stacked per-path weights (feature-last layout).
    Returns (B, P) f32 -- same as torch.cat([path(x) for path in paths], dim=1).

    Training-step note: the kernel is bound by W2 HBM traffic, so when scoring
    real and fake batches with the same weights, concatenate them along B and
    make one call -- W2 is then DMA'd once per pair instead of twice."""
    w1, b1 = params["w1"], params["b1"]
    w2, b2 = params["w2"], params["b2"]
    w3, b3 = params["w3"], params["b3"]
    P, d_in, H1 = w1.shape
    H2 = w2.shape[2]
    B = x.shape[0]

    n_cores = _num_tensorcores()
    Pb = _choose_path_block(P, n_cores, B, H1, H2, d_in)
    G = P // Pb

    vmem_limit = int(min(max(1.4 * _vmem_estimate(Pb, B, H1, H2, d_in)
                             + (4 << 20), 32 << 20), 60 << 20))

    out = pl.pallas_call(
        _disc_kernel,
        out_shape=jax.ShapeDtypeStruct((G, Pb, B), jnp.float32),
        grid_spec=pltpu.PrefetchScalarGridSpec(
            num_scalar_prefetch=0,
            grid=(G,),
            in_specs=[
                pl.BlockSpec((B, d_in), lambda g: (0, 0)),          # x (resident)
                pl.BlockSpec((Pb, d_in, H1), lambda g: (g, 0, 0)),  # W1
                pl.BlockSpec((Pb, 1, H1), lambda g: (g, 0, 0)),     # b1
                pl.BlockSpec((Pb, H1, H2), lambda g: (g, 0, 0)),    # W2
                pl.BlockSpec((Pb, 1, H2), lambda g: (g, 0, 0)),     # b2
                pl.BlockSpec((Pb, 1, H2), lambda g: (g, 0, 0)),     # W3 (row, lane-dense)
                pl.BlockSpec((Pb, 1, 1), lambda g: (g, 0, 0)),      # b3
            ],
            out_specs=pl.BlockSpec((1, Pb, B), lambda g: (g, 0, 0)),
        ),
        compiler_params=pltpu.CompilerParams(
            dimension_semantics=("parallel",),
            vmem_limit_bytes=vmem_limit),
    )(x, w1, b1, w2, b2, w3, b3)

    # (G, Pb, B) -> (P, B) -> (B, P), matching torch.cat(validity, dim=1).
    return out.reshape(P, B).T


def init_params(key, n_paths):
    """nn.Linear-style init (U(+-1/sqrt(fan_in))), stacked over paths, stored
    feature-last (lane-dense): weights (P, in, out), biases (P, 1, out).
    Weights ship as bf16 (halves the dominant HBM traffic, mainly W2);
    biases stay f32."""
    # TODO(synk): further quantize W2 to int8 (v5e/v6e) / fp8-e4m3 (v7x) with a
    # per-path scale folded into the activation path once tolerances allow.
    def linear(k, fan_in, fan_out):
        kw, kb = jax.random.split(k)
        bound = float(fan_in) ** -0.5
        w = jax.random.uniform(kw, (n_paths, fan_in, fan_out), jnp.float32,
                               -bound, bound)
        b = jax.random.uniform(kb, (n_paths, 1, fan_out), jnp.float32,
                               -bound, bound)
        return w, b

    k1, k2, k3 = jax.random.split(key, 3)
    w1, b1 = linear(k1, 2, 512)              # (P,2,512),   (P,1,512)
    w2, b2 = linear(k2, 512, 256)            # (P,512,256), (P,1,256)
    w3, b3 = linear(k3, 256, 1)              # (P,256,1),   (P,1,1)
    w3 = jnp.transpose(w3, (0, 2, 1))        # (P,1,256): output row along lanes
    return {"w1": w1.astype(jnp.bfloat16), "b1": b1,
            "w2": w2.astype(jnp.bfloat16), "b2": b2,
            "w3": w3.astype(jnp.bfloat16), "b3": b3}


def reference_forward(x, params):
    """Pure-JAX reference: f32 math on the same bf16-quantized weights."""
    P = params["w1"].shape[0]
    hi = jax.lax.Precision.HIGHEST
    outs = []
    for p in range(P):
        w1 = params["w1"][p].astype(jnp.float32)          # (2, 512)
        h = jnp.dot(x, w1, precision=hi) + params["b1"][p, 0]
        h = jnp.where(h > 0, h, 0.2 * h)
        w2 = params["w2"][p].astype(jnp.float32)          # (512, 256)
        h = jnp.dot(h, w2, precision=hi) + params["b2"][p, 0]
        h = jnp.where(h > 0, h, 0.2 * h)
        w3 = params["w3"][p, 0].astype(jnp.float32)       # (256,)
        o = jax.nn.sigmoid(jnp.dot(h, w3, precision=hi) + params["b3"][p, 0, 0])
        outs.append(o[:, None])                           # (B, 1)
    return jnp.concatenate(outs, axis=1)                  # (B, P)


if __name__ == "__main__":
    key = jax.random.PRNGKey(0)
    k_params, k_x = jax.random.split(key)

    n_paths_D = 4          # opt.n_paths_D
    batch = 8
    params = init_params(k_params, n_paths_D)
    x = jax.random.normal(k_x, (batch, 2), jnp.float32)

    out = jax.block_until_ready(discriminator_forward(x, params))
    ref = reference_forward(x, params)

    assert out.shape == (batch, n_paths_D), out.shape
    max_err = float(jnp.max(jnp.abs(out - ref)))
    assert jnp.allclose(out, ref, atol=5e-3, rtol=5e-3), max_err

    print("KERNEL_OK")
</pallas_src>

<mosaic_0001>
module attributes {stable_mosaic.version = 11 : i64} {
  func.func @_disc_kernel(%arg0: i32, %arg1: memref<8x2xf32, #tpu.memory_space<vmem>>, %arg2: memref<4x2x512xbf16, #tpu.memory_space<vmem>>, %arg3: memref<4x1x512xf32, #tpu.memory_space<vmem>>, %arg4: memref<4x512x256xbf16, #tpu.memory_space<vmem>>, %arg5: memref<4x1x256xf32, #tpu.memory_space<vmem>>, %arg6: memref<4x1x256xbf16, #tpu.memory_space<vmem>>, %arg7: memref<4x1x1xf32, #tpu.memory_space<vmem>>, %arg8: memref<1x4x8xf32, #tpu.memory_space<vmem>>) attributes {dimension_semantics = [#tpu.dimension_semantics<parallel>], iteration_bounds = array<i64: 1>, scalar_prefetch = 0 : i64, scratch_operands = 0 : i64, tpu.core_type = #tpu.core_type<tc>, window_params = [{pipeline_mode = #tpu.pipeline_mode<synchronous>, transform_indices = @transform_0, window_bounds = array<i64: 8, 2>}, {transform_indices = @transform_1, window_bounds = array<i64: 4, 2, 512>}, {transform_indices = @transform_2, window_bounds = array<i64: 4, 1, 512>}, {transform_indices = @transform_3, window_bounds = array<i64: 4, 512, 256>}, {transform_indices = @transform_4, window_bounds = array<i64: 4, 1, 256>}, {transform_indices = @transform_5, window_bounds = array<i64: 4, 1, 256>}, {transform_indices = @transform_6, window_bounds = array<i64: 4, 1, 1>}, {transform_indices = @transform_7, window_bounds = array<i64: 1, 4, 8>}]} {
    %c0 = arith.constant 0 : index
    %c0_0 = arith.constant 0 : index
    %0 = vector.load %arg1[%c0, %c0_0] : memref<8x2xf32, #tpu.memory_space<vmem>>, vector<8x2xf32>
    %c0_1 = arith.constant 0 : index
    %c0_2 = arith.constant 0 : index
    %c0_3 = arith.constant 0 : index
    %1 = vector.load %arg2[%c0_1, %c0_2, %c0_3] : memref<4x2x512xbf16, #tpu.memory_space<vmem>>, vector<4x2x512xbf16>
    %2 = arith.extf %1 : vector<4x2x512xbf16> to vector<4x2x512xf32>
    %c0_4 = arith.constant 0 : index
    %c0_5 = arith.constant 0 : index
    %c0_6 = arith.constant 0 : index
    %3 = vector.load %arg3[%c0_4, %c0_5, %c0_6] : memref<4x1x512xf32, #tpu.memory_space<vmem>>, vector<4x1x512xf32>
    %4 = vector.extract_strided_slice %0 {offsets = [0, 0], sizes = [8, 1], strides = [1, 1]} : vector<8x2xf32> to vector<8x1xf32>
    %5 = vector.shape_cast %4 : vector<8x1xf32> to vector<8xf32>
    %6 = vector.shape_cast %5 : vector<8xf32> to vector<1x8x1xf32>
    %7 = vector.extract_strided_slice %2 {offsets = [0, 0, 0], sizes = [4, 1, 512], strides = [1, 1, 1]} : vector<4x2x512xf32> to vector<4x1x512xf32>
    %8 = vector.broadcast %6 : vector<1x8x1xf32> to vector<4x8x512xf32>
    %9 = vector.broadcast %7 : vector<4x1x512xf32> to vector<4x8x512xf32>
    %10 = arith.mulf %8, %9 : vector<4x8x512xf32>
    %11 = vector.broadcast %3 : vector<4x1x512xf32> to vector<4x8x512xf32>
    %12 = arith.addf %11, %10 : vector<4x8x512xf32>
    %13 = vector.extract_strided_slice %0 {offsets = [0, 1], sizes = [8, 1], strides = [1, 1]} : vector<8x2xf32> to vector<8x1xf32>
    %14 = vector.shape_cast %13 : vector<8x1xf32> to vector<8xf32>
    %15 = vector.shape_cast %14 : vector<8xf32> to vector<1x8x1xf32>
    %16 = vector.extract_strided_slice %2 {offsets = [0, 1, 0], sizes = [4, 1, 512], strides = [1, 1, 1]} : vector<4x2x512xf32> to vector<4x1x512xf32>
    %17 = vector.broadcast %15 : vector<1x8x1xf32> to vector<4x8x512xf32>
    %18 = vector.broadcast %16 : vector<4x1x512xf32> to vector<4x8x512xf32>
    %19 = arith.mulf %17, %18 : vector<4x8x512xf32>
    %20 = arith.addf %12, %19 : vector<4x8x512xf32>
    %cst = arith.constant 0.000000e+00 : f32
    %21 = vector.broadcast %cst : f32 to vector<4x8x512xf32>
    %22 = arith.cmpf ogt, %20, %21 : vector<4x8x512xf32>
    %cst_7 = arith.constant 2.000000e-01 : f32
    %23 = vector.broadcast %cst_7 : f32 to vector<4x8x512xf32>
    %24 = arith.mulf %23, %20 : vector<4x8x512xf32>
    %25 = arith.select %22, %20, %24 : vector<4x8x512xi1>, vector<4x8x512xf32>
    %26 = arith.truncf %25 : vector<4x8x512xf32> to vector<4x8x512xbf16>
    %c0_8 = arith.constant 0 : index
    %c0_9 = arith.constant 0 : index
    %c0_10 = arith.constant 0 : index
    %27 = vector.load %arg4[%c0_8, %c0_9, %c0_10] : memref<4x512x256xbf16, #tpu.memory_space<vmem>>, vector<4x512x256xbf16>
    "tpu.trace_start"() <{level = 10 : i32, message = "pbk,pkn->pbn"}> : () -> ()
    %cst_11 = arith.constant dense<0.000000e+00> : vector<4x8x256xf32>
    %28 = tpu.matmul %26, %27, %cst_11 {dimension_numbers = #tpu.dot_dimension_numbers<[2], [1], [1], [2], [0, 0, 0, 1, 1, 2], [0], [0]>} : vector<4x8x512xbf16>, vector<4x512x256xbf16>, vector<4x8x256xf32> -> vector<4x8x256xf32>
    "tpu.trace_stop"() : () -> ()
    %c0_12 = arith.constant 0 : index
    %c0_13 = arith.constant 0 : index
    %c0_14 = arith.constant 0 : index
    %29 = vector.load %arg5[%c0_12, %c0_13, %c0_14] : memref<4x1x256xf32, #tpu.memory_space<vmem>>, vector<4x1x256xf32>
    %30 = vector.broadcast %29 : vector<4x1x256xf32> to vector<4x8x256xf32>
    %31 = arith.addf %28, %30 : vector<4x8x256xf32>
    %cst_15 = arith.constant 0.000000e+00 : f32
    %32 = vector.broadcast %cst_15 : f32 to vector<4x8x256xf32>
    %33 = arith.cmpf ogt, %31, %32 : vector<4x8x256xf32>
    %cst_16 = arith.constant 2.000000e-01 : f32
    %34 = vector.broadcast %cst_16 : f32 to vector<4x8x256xf32>
    %35 = arith.mulf %34, %31 : vector<4x8x256xf32>
    %36 = arith.select %33, %31, %35 : vector<4x8x256xi1>, vector<4x8x256xf32>
    %c0_17 = arith.constant 0 : index
    %c0_18 = arith.constant 0 : index
    %c0_19 = arith.constant 0 : index
    %37 = vector.load %arg6[%c0_17, %c0_18, %c0_19] : memref<4x1x256xbf16, #tpu.memory_space<vmem>>, vector<4x1x256xbf16>
    %38 = arith.extf %37 : vector<4x1x256xbf16> to vector<4x1x256xf32>
    %39 = vector.broadcast %38 : vector<4x1x256xf32> to vector<4x8x256xf32>
    %40 = arith.mulf %36, %39 : vector<4x8x256xf32>
    %cst_20 = arith.constant dense<0.000000e+00> : vector<4x8xf32>
    %41 = vector.multi_reduction <add>, %40, %cst_20 [2] : vector<4x8x256xf32> to vector<4x8xf32>
    %c0_21 = arith.constant 0 : index
    %c0_22 = arith.constant 0 : index
    %c0_23 = arith.constant 0 : index
    %42 = vector.load %arg7[%c0_21, %c0_22, %c0_23] : memref<4x1x1xf32, #tpu.memory_space<vmem>>, vector<4x1x1xf32>
    %43 = vector.shape_cast %42 : vector<4x1x1xf32> to vector<4x1xf32>
    %44 = vector.broadcast %43 : vector<4x1xf32> to vector<4x8xf32>
    %45 = arith.addf %41, %44 : vector<4x8xf32>
    %46 = arith.negf %45 : vector<4x8xf32>
    %47 = math.exp %46 : vector<4x8xf32>
    %cst_24 = arith.constant 1.000000e+00 : f32
    %48 = vector.broadcast %cst_24 : f32 to vector<4x8xf32>
    %49 = arith.addf %48, %47 : vector<4x8xf32>
    %50 = arith.divf %48, %49 : vector<4x8xf32>
    %c0_25 = arith.constant 0 : index
    %c0_26 = arith.constant 0 : index
    %c0_27 = arith.constant 0 : index
    %51 = vector.load %arg8[%c0_25, %c0_26, %c0_27] : memref<1x4x8xf32, #tpu.memory_space<vmem>>, vector<1x4x8xf32>
    %52 = vector.shape_cast %51 : vector<1x4x8xf32> to vector<4x8xf32>
    %53 = vector.shape_cast %50 : vector<4x8xf32> to vector<1x4x8xf32>
    tpu.vector_store %arg8[%c0_25, %c0_26, %c0_27], %53 {strides = array<i32>} : memref<1x4x8xf32, #tpu.memory_space<vmem>>, vector<1x4x8xf32>,
    return
  }
  func.func @transform_0(%arg0: i32) -> (i32, i32) {
    %c0_i32 = arith.constant 0 : i32
    %c0_i32_0 = arith.constant 0 : i32
    %c0_i32_1 = arith.constant 0 : i32
    return %c0_i32, %c0_i32_0 : i32, i32
  }
  func.func @transform_1(%arg0: i32) -> (i32, i32, i32) {
    %c0_i32 = arith.constant 0 : i32
    %c0_i32_0 = arith.constant 0 : i32
    %c0_i32_1 = arith.constant 0 : i32
    return %arg0, %c0_i32, %c0_i32_0 : i32, i32, i32
  }
  func.func @transform_2(%arg0: i32) -> (i32, i32, i32) {
    %c0_i32 = arith.constant 0 : i32
    %c0_i32_0 = arith.constant 0 : i32
    %c0_i32_1 = arith.constant 0 : i32
    return %arg0, %c0_i32, %c0_i32_0 : i32, i32, i32
  }
  func.func @transform_3(%arg0: i32) -> (i32, i32, i32) {
    %c0_i32 = arith.constant 0 : i32
    %c0_i32_0 = arith.constant 0 : i32
    %c0_i32_1 = arith.constant 0 : i32
    return %arg0, %c0_i32, %c0_i32_0 : i32, i32, i32
  }
  func.func @transform_4(%arg0: i32) -> (i32, i32, i32) {
    %c0_i32 = arith.constant 0 : i32
    %c0_i32_0 = arith.constant 0 : i32
    %c0_i32_1 = arith.constant 0 : i32
    return %arg0, %c0_i32, %c0_i32_0 : i32, i32, i32
  }
  func.func @transform_5(%arg0: i32) -> (i32, i32, i32) {
    %c0_i32 = arith.constant 0 : i32
    %c0_i32_0 = arith.constant 0 : i32
    %c0_i32_1 = arith.constant 0 : i32
    return %arg0, %c0_i32, %c0_i32_0 : i32, i32, i32
  }
  func.func @transform_6(%arg0: i32) -> (i32, i32, i32) {
    %c0_i32 = arith.constant 0 : i32
    %c0_i32_0 = arith.constant 0 : i32
    %c0_i32_1 = arith.constant 0 : i32
    return %arg0, %c0_i32, %c0_i32_0 : i32, i32, i32
  }
  func.func @transform_7(%arg0: i32) -> (i32, i32, i32) {
    %c0_i32 = arith.constant 0 : i32
    %c0_i32_0 = arith.constant 0 : i32
    %c0_i32_1 = arith.constant 0 : i32
    return %arg0, %c0_i32, %c0_i32_0 : i32, i32, i32
  }
}

</mosaic_0001>

<bundles_post_ra>
// kernel: discriminator_forward.1
= control target key start
LH: loop header
LB: loop body
LE: loop exit
PB: predicated region body
PF: predicated region fallthrough
CT: control target
= control target key end

     0   :  { %12 = vsyncpa [#allocation3], 0  ;;  %s4017_s0 = inlined_call_operand.vmem [shape: f32[8,2], index: 0, kind: input, shape index: {}]   ;;  %s4018_s1 = inlined_call_operand.vmem [shape: bf16[4,2,512], index: 1, kind: input, shape index: {}]   ;;  %s4019_s2 = inlined_call_operand.hbm [shape: f32[4,1,512], index: 2, kind: input, shape index: {}]   ;;  %s4020_s3 = inlined_call_operand.hbm [shape: bf16[4,512,256], index: 3, kind: input, shape index: {}]   ;;  %s4021_s4 = inlined_call_operand.vmem [shape: f32[4,1,256], index: 4, kind: input, shape index: {}]   ;;  %s4022_s5 = inlined_call_operand.vmem [shape: bf16[4,1,256], index: 5, kind: input, shape index: {}]   ;;  %s4023_s6 = inlined_call_operand.vmem [shape: f32[4,1,1], index: 6, kind: input, shape index: {}]   ;;  %s4024_s7 = inlined_call_operand.hbm [shape: f32[1,4,8], index: 7, kind: output, shape index: {}]  }
   0x1   :  { %13 = vsyncpa [#allocation6], 0 }
   0x2   :  { %14 = vsyncpa [#allocation4], 0  ;;  %s3587_s24 = smov [#allocation2]   ;;  %s3515_s28 = scalar_lea.hbm %s4019_s2, 256 }
   0x3   :  { %s24_s25 = sshll.u32 %s3587_s24, 4  ;;  %p3516_p0 = scmp.ne.s32.totalorder %s4019_s2, %s3515_s28  ;;  %s25_s25 = int_to_ptr.vmem [resolvable:$true] %s24_s25 }
   0x4   :  { %p3519_p1 = scmp.lt.u32.totalorder %s3515_s28, %s4019_s2 }
   0x6   :  { %p3521_p2 = pnand %p3519_p1, %p3516_p0 }
   0x8   :  { %3524 = shalt.err (!%p3521_p2)
}
   0x9   :  { %s3525_s10 = scalar_lea.vmem %s25_s25, 256  ;;  %p3530_p4 = scmp.lt.s32.totalorder %s25_s25, %s25_s25 }
   0xa   :  { %p3526_p3 = scmp.ne.s32.totalorder %s25_s25, %s3525_s10  ;;  %p3531_p5 = scmp.lt.s32.totalorder %s3525_s10, %s3525_s10 }
   0xc   :  { %p3532_p6 = por %p3531_p5, %p3530_p4 }
   0xe   :  { %p3533_p7 = pnand %p3532_p6, %p3526_p3 }
  0x10   :  { %3536 = shalt.err (!%p3533_p7)
}
  0x11   :  { %s3588_s11 = smov 64   ;;  %s3589_s12 = smov 4  }
  0x12   :  { %30 = dma.hbm_to_vmem [thread:$0]  %s4019_s2, 256, %s25_s25, [#allocation3], %s3588_s11, %s3588_s11, %s3589_s12  }
  0x13   :  { %s3590_s15 = smov [#allocation5]   ;;  %s3537_s19 = scalar_lea.hbm %s4020_s3, 32768 }
  0x14   :  { %s36_s16 = sshll.u32 %s3590_s15, 4  ;;  %p3538_p8 = scmp.ne.s32.totalorder %s4020_s3, %s3537_s19  ;;  %s37_s16 = int_to_ptr.vmem [resolvable:$true] %s36_s16 }
  0x15   :  { %p3541_p9 = scmp.lt.u32.totalorder %s3537_s19, %s4020_s3 }
  0x17   :  { %p3543_p10 = pnand %p3541_p9, %p3538_p8 }
  0x19   :  { %3546 = shalt.err (!%p3543_p10)
}
  0x1a   :  { %s3547_s24 = scalar_lea.vmem %s37_s16, 32768  ;;  %p3552_p12 = scmp.lt.s32.totalorder %s37_s16, %s37_s16 }
  0x1b   :  { %p3548_p11 = scmp.ne.s32.totalorder %s37_s16, %s3547_s24  ;;  %p3553_p13 = scmp.lt.s32.totalorder %s3547_s24, %s3547_s24 }
  0x1d   :  { %p3554_p0 = por %p3553_p13, %p3552_p12 }
  0x1f   :  { %p3555_p1 = pnand %p3554_p0, %p3548_p11 }
  0x21   :  { %3558 = shalt.err (!%p3555_p1)
}
  0x22   :  { %s3591_s2 = smov 128   ;;  %s3592_s25 = smov 8  }
  0x23   :  { %42 = dma.hbm_to_vmem [thread:$0]  %s4020_s3, 32768, %s37_s16, [#allocation6], %s3591_s2, %s3591_s2, %s3592_s25  }
  0x24   :  { %3581 = dma.done.wait [#allocation3], 256  }
  0x25   :  { %3582 = vsyncadd [#allocation3], 4294967040 }
  0x26   :  { %3583 = dma.done.wait [#allocation6], 32768  }
  0x27   :  { %3584 = vsyncadd [#allocation6], 4294934528  ;;  %v3593_v0 = vmov 0   ;;  %v55_v1 = vld [vmem:[%s4017_s0] sm:$0xff]  ;;  %v3115_v2 = vld [vmem:[#allocation5 + $0x4] ss:$8 sps:$4 sm:$0xff]  }
  0x28   :  { %3111 = vset.pattern.permute.xlu0 %v3593_v0  ;;  %3113 = vset.pattern.permute.xlu1 %v3593_v0  ;;  %v3117_v3 = vld [vmem:[#allocation5 + $0x204] ss:$8 sps:$4 sm:$0xff]   ;;  %v3119_v4 = vld [vmem:[#allocation5] ss:$8 sps:$4 sm:$0xff]   ;;  %v3121_v6 = vld [vmem:[#allocation5 + $0x14] ss:$8 sps:$4 sm:$0xff]  }
  0x29   :  { %70 = vperm.xlu0 %3111, %v55_v1   ;;  %v3120_v5 = vld [vmem:[#allocation5 + $0x200] ss:$8 sps:$4 sm:$0xff]   ;;  %1205 = vmatprep.subr.bf16.mxu0 %v3115_v2  ;;  %v3123_v7 = vld [vmem:[#allocation5 + $0x214] ss:$8 sps:$4 sm:$0xff]   ;;  %v3594_v8 = vmov 1  }
  0x2a   :  { %1607 = vmatprep.subr.bf16.mxu1 %v3117_v3  ;;  %1206 = vmatpush1.bf16.msra.mxu0 %v3119_v4  ;;  %v3125_v9 = vld [vmem:[#allocation5 + $0x10] ss:$8 sps:$4 sm:$0xff]   ;;  %v3127_v11 = vld [vmem:[#allocation5 + $0x24] ss:$8 sps:$4 sm:$0xff]   ;;  %v3131_v13 = vld [vmem:[#allocation5 + $0x20] ss:$8 sps:$4 sm:$0xff]  }
  0x2b   :  { %1608 = vmatpush1.bf16.msra.mxu1 %v3120_v5  ;;  %v3126_v10 = vld [vmem:[#allocation5 + $0x210] ss:$8 sps:$4 sm:$0xff]   ;;  %1207 = vmatprep.subr.bf16.mxu0 %v3121_v6  ;;  %v3129_v12 = vld [vmem:[#allocation5 + $0x224] ss:$8 sps:$4 sm:$0xff]   ;;  %v3132_v14 = vld [vmem:[#allocation5 + $0x220] ss:$8 sps:$4 sm:$0xff]   ;;  %v77_v5 = vlaneseq }
  0x2c   :  { %1609 = vmatprep.subr.bf16.mxu1 %v3123_v7  ;;  %v3133_v15 = vld [vmem:[#allocation5 + $0x34] ss:$8 sps:$4 sm:$0xff]   ;;  %v3137_v17 = vld [vmem:[#allocation5 + $0x30] ss:$8 sps:$4 sm:$0xff]   ;;  %v3139_v19 = vld [vmem:[#allocation5 + $0x44] ss:$8 sps:$4 sm:$0xff]  }
  0x2d   :  { %3112 = vset.pattern.permute.xlu0 %v3594_v8  ;;  %v3135_v16 = vld [vmem:[#allocation5 + $0x234] ss:$8 sps:$4 sm:$0xff]   ;;  %v3138_v18 = vld [vmem:[#allocation5 + $0x230] ss:$8 sps:$4 sm:$0xff]   ;;  %v3141_v20 = vld [vmem:[#allocation5 + $0x244] ss:$8 sps:$4 sm:$0xff]  }
  0x2e   :  { %338 = vperm.xlu0 %3112, %v55_v1   ;;  %1208 = vmatpush1.bf16.msra.mxu0 %v3125_v9  ;;  %v3143_v21 = vld [vmem:[#allocation5 + $0x40] ss:$8 sps:$4 sm:$0xff]   ;;  %v3145_v23 = vld [vmem:[#allocation5 + $0x54] ss:$8 sps:$4 sm:$0xff]   ;;  %v3149_v25 = vld [vmem:[#allocation5 + $0x50] ss:$8 sps:$4 sm:$0xff]  }
  0x2f   :  { %1610 = vmatpush1.bf16.msra.mxu1 %v3126_v10  ;;  %1209 = vmatprep.subr.bf16.mxu0 %v3127_v11  ;;  %v3144_v22 = vld [vmem:[#allocation5 + $0x240] ss:$8 sps:$4 sm:$0xff]   ;;  %v3147_v24 = vld [vmem:[#allocation5 + $0x254] ss:$8 sps:$4 sm:$0xff]   ;;  %v3150_v26 = vld [vmem:[#allocation5 + $0x250] ss:$8 sps:$4 sm:$0xff]  }
  0x30   :  { %1611 = vmatprep.subr.bf16.mxu1 %v3129_v12  ;;  %v3151_v27 = vld [vmem:[#allocation5 + $0x64] ss:$8 sps:$4 sm:$0xff]   ;;  %v3155_v29 = vld [vmem:[#allocation5 + $0x60] ss:$8 sps:$4 sm:$0xff]   ;;  %v3157_v31 = vld [vmem:[#allocation5 + $0x74] ss:$8 sps:$4 sm:$0xff]  }
  0x31   :  { %v3153_v28 = vld [vmem:[#allocation5 + $0x264] ss:$8 sps:$4 sm:$0xff]   ;;  %v3156_v30 = vld [vmem:[#allocation5 + $0x260] ss:$8 sps:$4 sm:$0xff]   ;;  %v3159_v32 = vld [vmem:[#allocation5 + $0x274] ss:$8 sps:$4 sm:$0xff]  }
  0x32   :  { %3114 = vset.pattern.permute.xlu0 %v3593_v0  ;;  %1210 = vmatpush1.bf16.msra.mxu0 %v3131_v13  ;;  %v3161_v33 = vld [vmem:[#allocation5 + $0x70] ss:$8 sps:$4 sm:$0xff]   ;;  %v3163_v35 = vld [vmem:[#allocation5 + $0x84] ss:$8 sps:$4 sm:$0xff]   ;;  %v3167_v37 = vld [vmem:[#allocation5 + $0x80] ss:$8 sps:$4 sm:$0xff]  }
  0x33   :  { %1612 = vmatpush1.bf16.msra.mxu1 %v3132_v14  ;;  %1211 = vmatprep.subr.bf16.mxu0 %v3133_v15  ;;  %v3162_v34 = vld [vmem:[#allocation5 + $0x270] ss:$8 sps:$4 sm:$0xff]   ;;  %v3165_v36 = vld [vmem:[#allocation5 + $0x284] ss:$8 sps:$4 sm:$0xff]   ;;  %v3168_v38 = vld [vmem:[#allocation5 + $0x280] ss:$8 sps:$4 sm:$0xff]  }
  0x34   :  { %1613 = vmatprep.subr.bf16.mxu1 %v3135_v16  ;;  %v3169_v39 = vld [vmem:[#allocation5 + $0x94] ss:$8 sps:$4 sm:$0xff]   ;;  %v3173_v41 = vld [vmem:[#allocation5 + $0x90] ss:$8 sps:$4 sm:$0xff]   ;;  %v3175_v43 = vld [vmem:[#allocation5 + $0xa4] ss:$8 sps:$4 sm:$0xff]  }
  0x35   :  { %v3171_v40 = vld [vmem:[#allocation5 + $0x294] ss:$8 sps:$4 sm:$0xff]   ;;  %v3174_v42 = vld [vmem:[#allocation5 + $0x290] ss:$8 sps:$4 sm:$0xff]   ;;  %v3177_v44 = vld [vmem:[#allocation5 + $0x2a4] ss:$8 sps:$4 sm:$0xff]  }
  0x36   :  { %1212 = vmatpush1.bf16.msra.mxu0 %v3137_v17  ;;  %v3179_v45 = vld [vmem:[#allocation5 + $0xa0] ss:$8 sps:$4 sm:$0xff]   ;;  %v3181_v47 = vld [vmem:[#allocation5 + $0xb4] ss:$8 sps:$4 sm:$0xff]   ;;  %v3185_v49 = vld [vmem:[#allocation5 + $0xb0] ss:$8 sps:$4 sm:$0xff]  }
  0x37   :  { %1614 = vmatpush1.bf16.msra.mxu1 %v3138_v18  ;;  %1213 = vmatprep.subr.bf16.mxu0 %v3139_v19  ;;  %v3180_v46 = vld [vmem:[#allocation5 + $0x2a0] ss:$8 sps:$4 sm:$0xff]   ;;  %v3183_v48 = vld [vmem:[#allocation5 + $0x2b4] ss:$8 sps:$4 sm:$0xff]   ;;  %v3186_v50 = vld [vmem:[#allocation5 + $0x2b0] ss:$8 sps:$4 sm:$0xff]  }
  0x38   :  { %1615 = vmatprep.subr.bf16.mxu1 %v3141_v20  ;;  %v3187_v51 = vld [vmem:[#allocation5 + $0xc4] ss:$8 sps:$4 sm:$0xff]   ;;  %v3191_v53 = vld [vmem:[#allocation5 + $0xc0] ss:$8 sps:$4 sm:$0xff]   ;;  %v3193_v55 = vld [vmem:[#allocation5 + $0xd4] ss:$8 sps:$4 sm:$0xff]  }
  0x39   :  { %v3189_v52 = vld [vmem:[#allocation5 + $0x2c4] ss:$8 sps:$4 sm:$0xff]   ;;  %v3192_v54 = vld [vmem:[#allocation5 + $0x2c0] ss:$8 sps:$4 sm:$0xff]   ;;  %v3195_v56 = vld [vmem:[#allocation5 + $0x2d4] ss:$8 sps:$4 sm:$0xff]  }
  0x3a   :  { %1214 = vmatpush1.bf16.msra.mxu0 %v3143_v21  ;;  %v3197_v57 = vld [vmem:[#allocation5 + $0xd0] ss:$8 sps:$4 sm:$0xff]   ;;  %v3199_v59 = vld [vmem:[#allocation5 + $0xe4] ss:$8 sps:$4 sm:$0xff]   ;;  %v3203_v61 = vld [vmem:[#allocation5 + $0xe0] ss:$8 sps:$4 sm:$0xff]  }
  0x3b   :  { %1616 = vmatpush1.bf16.msra.mxu1 %v3144_v22  ;;  %1215 = vmatprep.subr.bf16.mxu0 %v3145_v23  ;;  %v3198_v58 = vld [vmem:[#allocation5 + $0x2d0] ss:$8 sps:$4 sm:$0xff]   ;;  %v3201_v60 = vld [vmem:[#allocation5 + $0x2e4] ss:$8 sps:$4 sm:$0xff]   ;;  %v3204_v62 = vld [vmem:[#allocation5 + $0x2e0] ss:$8 sps:$4 sm:$0xff]  }
  0x3c   :  { %1617 = vmatprep.subr.bf16.mxu1 %v3147_v24  ;;  %v3205_v63 = vld [vmem:[#allocation5 + $0xf4] ss:$8 sps:$4 sm:$0xff]   ;;  %v3209_v1 = vld [vmem:[#allocation5 + $0xf0] ss:$8 sps:$4 sm:$0xff]   ;;  %v3213_v3 = vld [vmem:[#allocation5 + $0x104] ss:$8 sps:$4 sm:$0xff]  }
  0x3d   :  { %v3207_v0 = vld [vmem:[#allocation5 + $0x2f4] ss:$8 sps:$4 sm:$0xff]   ;;  %v3210_v2 = vld [vmem:[#allocation5 + $0x2f0] ss:$8 sps:$4 sm:$0xff]   ;;  %v3216_v4 = vld [vmem:[#allocation5 + $0x304] ss:$8 sps:$4 sm:$0xff]  }
  0x3e   :  { %1216 = vmatpush1.bf16.msra.mxu0 %v3149_v25  ;;  %v3665_v6 = vshrl.u32 %v77_v5, 7  ;;  %v3076_v7 = vld [vmem:[%s4018_s1 + $0x8] sm:$0xff]   ;;  %v3069_v22 = vld [vmem:[%s4018_s1] sm:$0xff]  }
  0x3f   :  { %1618 = vmatpush1.bf16.msra.mxu1 %v3150_v26  ;;  %1217 = vmatprep.subr.bf16.mxu0 %v3151_v27  ;;  %v3676_v10 = vunpack.c.l.bf16 %v3076_v7  ;;  %v3678_v11 = vunpack.c.h.bf16 %v3076_v7  ;;  %v3070_v23 = vunpack.c.l.bf16 %v3069_v22  ;;  %v3071_v26 = vunpack.c.h.bf16 %v3069_v22  ;;  %v3711_v27 = vld [vmem:[#allocation2] sm:$0xf] }
  0x40   :  { %1619 = vmatprep.subr.bf16.mxu1 %v3153_v28  ;;  %v3671_v8 = vsub.s32 6, %v3665_v6  ;;  %v3674_v9 = vsub.s32 7, %v3665_v6  ;;  %v3681_v12 = vsub.s32 4, %v3665_v6  ;;  %v3684_v13 = vsub.s32 5, %v3665_v6  ;;  %v2623_v22 = vld [vmem:[%s4023_s6 + $0x2] sm:$0x1] }
  0x41   :  { %v3706_v24 = vsub.s32 2, %v3665_v6  ;;  %v3709_v25 = vsub.s32 3, %v3665_v6  ;;  %v3714_v28 = vsub.s32 1, %v3665_v6 }
  0x42   :  { %1218 = vmatpush1.bf16.msra.mxu0 %v3155_v29  ;;  %v124_v14 = vrot.slane %v3676_v10, %v3671_v8  ;;  %v388_v15 = vrot.slane %v3676_v10, %v3674_v9  ;;  %v140_v16 = vrot.slane %v3678_v11, %v3671_v8  ;;  %v404_v17 = vrot.slane %v3678_v11, %v3674_v9  ;;  %v3716_v29 = vld [vmem:[#allocation2 + $0x4] sm:$0xf] }
  0x43   :  { %1620 = vmatpush1.bf16.msra.mxu1 %v3156_v30  ;;  %1219 = vmatprep.subr.bf16.mxu0 %v3157_v31  ;;  %v120_v18 = vrot.slane %v3676_v10, %v3681_v12  ;;  %v384_v19 = vrot.slane %v3676_v10, %v3684_v13  ;;  %v136_v20 = vrot.slane %v3678_v11, %v3681_v12  ;;  %v3719_v30 = vsub.s32 0, %v3665_v6 }
  0x44   :  { %1621 = vmatprep.subr.bf16.mxu1 %v3159_v32  ;;  %v400_v21 = vrot.slane %v3678_v11, %v3684_v13  ;;  %v84_v31 = vrot.slane %v3070_v23, %v3706_v24  ;;  %v348_v32 = vrot.slane %v3070_v23, %v3709_v25 }
  0x46   :  { %1220 = vmatpush1.bf16.msra.mxu0 %v3161_v33  ;;  %v100_v33 = vrot.slane %v3071_v26, %v3706_v24 }
  0x47   :  { %1622 = vmatpush1.bf16.msra.mxu1 %v3162_v34  ;;  %1221 = vmatprep.subr.bf16.mxu0 %v3163_v35  ;;  %v248_v34 = vrot.slane %v3711_v27, %v3714_v28  ;;  %v244_v35 = vrot.slane %v3711_v27, %v3719_v30 }
  0x48   :  { %1623 = vmatprep.subr.bf16.mxu1 %v3165_v36  ;;  %v2621_v36 = vld [vmem:[%s4023_s6] sm:$0x1] }
  0x49   :  { %2627 = vperm.xlu1 %3113, %v2621_v36  }
  0x4a   :  { %1222 = vmatpush1.bf16.msra.mxu0 %v3167_v37  ;;  %v264_v37 = vrot.slane %v3716_v29, %v3714_v28 }
  0x4b   :  { %1624 = vmatpush1.bf16.msra.mxu1 %v3168_v38  ;;  %1223 = vmatprep.subr.bf16.mxu0 %v3169_v39  ;;  %v364_v38 = vrot.slane %v3071_v26, %v3709_v25  ;;  %v256_v39 = vrot.slane %v3711_v27, %v3709_v25 }
  0x4c   :  { %1625 = vmatprep.subr.bf16.mxu1 %v3171_v40  ;;  %v252_v40 = vrot.slane %v3711_v27, %v3706_v24 }
  0x4e   :  { %1224 = vmatpush1.bf16.msra.mxu0 %v3173_v41  ;;  %v164_v41 = vrot.slane %v84_v31, %v3719_v30 }
  0x4f   :  { %1626 = vmatpush1.bf16.msra.mxu1 %v3174_v42  ;;  %1225 = vmatprep.subr.bf16.mxu0 %v3175_v43  ;;  %v80_v42 = vrot.slane %v3070_v23, %v3719_v30  ;;  %v344_v43 = vrot.slane %v3070_v23, %v3714_v28 }
  0x50   :  { %1627 = vmatprep.subr.bf16.mxu1 %v3177_v44  ;;  %v96_v44 = vrot.slane %v3071_v26, %v3719_v30 }
  0x52   :  { %1226 = vmatpush1.bf16.msra.mxu0 %v3179_v45  ;;  %v428_v45 = vrot.slane %v348_v32, %v3714_v28 }
  0x53   :  { %1628 = vmatpush1.bf16.msra.mxu1 %v3180_v46  ;;  %1227 = vmatprep.subr.bf16.mxu0 %v3181_v47  ;;  %v180_v46 = vrot.slane %v100_v33, %v3719_v30  ;;  %v260_v47 = vrot.slane %v3716_v29, %v3719_v30  ;;  %v268_v33 = vrot.slane %v3716_v29, %v3706_v24 }
  0x54   :  { %1629 = vmatprep.subr.bf16.mxu1 %v3183_v48  ;;  %v360_v48 = vrot.slane %v3071_v26, %v3714_v28 }
  0x56   :  { %1228 = vmatpush1.bf16.msra.mxu0 %v3185_v49  ;;  %v92_v49 = vrot.slane %v3070_v23, %v3671_v8 }
  0x57   :  { %1630 = vmatpush1.bf16.msra.mxu1 %v3186_v50  ;;  %1229 = vmatprep.subr.bf16.mxu0 %v3187_v51  ;;  %v108_v50 = vrot.slane %v3071_v26, %v3671_v8  ;;  %v88_v51 = vrot.slane %v3070_v23, %v3681_v12  ;;  %v484_v8 = vrot.slane %v404_v17, %v3714_v28 }
  0x58   :  { %1631 = vmatprep.subr.bf16.mxu1 %v3189_v52  ;;  %v104_v52 = vrot.slane %v3071_v26, %v3681_v12  ;;  %v216_v17 = vrot.slane %v136_v20, %v3719_v30  ;;  %v3235_v20 = vld [vmem:[#allocation5 + $0x140] ss:$8 sps:$4 sm:$0xff]  }
  0x5a   :  { %1230 = vmatpush1.bf16.msra.mxu0 %v3191_v53  ;;  %v2622_v53 = vld [vmem:[%s4023_s6 + $0x1] sm:$0x1]  ;;  %v184_v7 = vrot.slane %v104_v52, %v3719_v30 }
  0x5b   :  { %1632 = vmatpush1.bf16.msra.mxu1 %v3192_v54  ;;  %1231 = vmatprep.subr.bf16.mxu0 %v3193_v55  ;;  %v444_v54 = vrot.slane %v364_v38, %v3714_v28  ;;  %v356_v55 = vrot.slane %v3070_v23, %v3674_v9 }
  0x5c   :  { %1633 = vmatprep.subr.bf16.mxu1 %v3195_v56  ;;  %v372_v56 = vrot.slane %v3071_v26, %v3674_v9  ;;  %2636 = vperm.xlu1 %3113, %v2622_v53   ;;  %v464_v9 = vrot.slane %v384_v19, %v3714_v28 }
  0x5e   :  { %1232 = vmatpush1.bf16.msra.mxu0 %v3197_v57  ;;  %v352_v57 = vrot.slane %v3070_v23, %v3684_v13  ;;  %v2624_v23 = vld [vmem:[%s4023_s6 + $0x3] sm:$0x1]  ;;  %v452_v27 = vrot.slane %v372_v56, %v3714_v28  ;;  %v376_v56 = vrot.slane %v3676_v10, %v3714_v28 }
  0x5f   :  { %1634 = vmatpush1.bf16.msra.mxu1 %v3198_v58  ;;  %1233 = vmatprep.subr.bf16.mxu0 %v3199_v59  ;;  %v160_v58 = vrot.slane %v80_v42, %v3719_v30  ;;  %v368_v59 = vrot.slane %v3071_v26, %v3684_v13  ;;  %v436_v26 = vrot.slane %v356_v55, %v3714_v28 }
  0x60   :  { %1635 = vmatprep.subr.bf16.mxu1 %v3201_v60  ;;  %v112_v60 = vrot.slane %v3676_v10, %v3719_v30  ;;  %v432_v31 = vrot.slane %v352_v57, %v3714_v28  ;;  %2645 = vperm.xlu1 %3113, %v2623_v22  }
  0x61   :  { %2654 = vperm.xlu0 %3114, %v2624_v23   ;;  %v448_v36 = vrot.slane %v368_v59, %v3714_v28 }
  0x62   :  { %1234 = vmatpush1.bf16.msra.mxu0 %v3203_v61  ;;  %v128_v61 = vrot.slane %v3678_v11, %v3719_v30  ;;  %v192_v38 = vrot.slane %v112_v60, %v3719_v30 }
  0x63   :  { %1636 = vmatpush1.bf16.msra.mxu1 %v3204_v62  ;;  %1235 = vmatprep.subr.bf16.mxu0 %v3205_v63  ;;  %v424_v62 = vrot.slane %v344_v43, %v3714_v28  ;;  %v176_v63 = vrot.slane %v96_v44, %v3719_v30 }
  0x64   :  { %1637 = vmatprep.subr.bf16.mxu1 %v3207_v0  ;;  %v440_v0 = vrot.slane %v360_v48, %v3714_v28  ;;  %v208_v42 = vrot.slane %v128_v61, %v3719_v30 }
  0x66   :  { %1236 = vmatpush1.bf16.msra.mxu0 %v3209_v1  ;;  %v272_v1 = vrot.slane %v3716_v29, %v3709_v25 }
  0x67   :  { %1638 = vmatpush1.bf16.msra.mxu1 %v3210_v2  ;;  %1246 = vmatprep.subr.bf16.mxu0 %v3213_v3  ;;  %v172_v2 = vrot.slane %v92_v49, %v3719_v30  ;;  %v188_v3 = vrot.slane %v108_v50, %v3719_v30 }
  0x68   :  { %1648 = vmatprep.subr.bf16.mxu1 %v3216_v4  ;;  %v168_v4 = vrot.slane %v88_v51, %v3719_v30 }
  0xa8   :  { %v3782_v32 = vpop.permute.xlu0 %70 }
  0xa9   :  { %v222_v43 = vmul.f32 %v164_v41, %v3782_v32  ;;  %v226_v44 = vmul.f32 %v180_v46, %v3782_v32  ;;  %v221_v48 = vmul.f32 %v160_v58, %v3782_v32  ;;  %v225_v49 = vmul.f32 %v176_v63, %v3782_v32 }
  0xaa   :  { %v224_v50 = vmul.f32 %v172_v2, %v3782_v32  ;;  %v228_v51 = vmul.f32 %v188_v3, %v3782_v32  ;;  %v223_v29 = vmul.f32 %v168_v4, %v3782_v32  ;;  %v227_v52 = vmul.f32 %v184_v7, %v3782_v32 }
  0xab   :  { %v322_v53 = vadd.f32 %v248_v34, %v222_v43  ;;  %v326_v55 = vadd.f32 %v264_v37, %v226_v44  ;;  %v392_v41 = vrot.slane %v3678_v11, %v3714_v28  ;;  %v321_v46 = vadd.f32 %v244_v35, %v221_v48  ;;  %v3823_v48 = vld [vmem:[#allocation2 + $0xc] sm:$0xf] }
  0xac   :  { %v325_v57 = vadd.f32 %v260_v47, %v225_v49  ;;  %v323_v58 = vadd.f32 %v252_v40, %v223_v29  ;;  %v327_v59 = vadd.f32 %v268_v33, %v227_v52  ;;  %v324_v61 = vadd.f32 %v256_v39, %v224_v50  ;;  %v3211_v50 = vld [vmem:[#allocation5 + $0x100] ss:$8 sps:$4 sm:$0xff]  }
  0xad   :  { %v3801_v60 = vpop.permute.xlu0 %338  ;;  %v328_v63 = vadd.f32 %v272_v1, %v228_v51  ;;  %v3804_v2 = vmul.f32 %v192_v38, %v3782_v32  ;;  %v3807_v34 = vmul.f32 %v208_v42, %v3782_v32  ;;  %v3214_v29 = vld [vmem:[#allocation5 + $0x300] ss:$8 sps:$4 sm:$0xff]  }
  0xae   :  { %v486_v37 = vmul.f32 %v428_v45, %v3801_v60  ;;  %v490_v3 = vmul.f32 %v444_v54, %v3801_v60  ;;  %v485_v4 = vmul.f32 %v424_v62, %v3801_v60  ;;  %v489_v35 = vmul.f32 %v440_v0, %v3801_v60 }
  0xaf   :  { %v488_v40 = vmul.f32 %v436_v26, %v3801_v60  ;;  %v492_v47 = vmul.f32 %v452_v27, %v3801_v60  ;;  %v487_v39 = vmul.f32 %v432_v31, %v3801_v60  ;;  %v491_v1 = vmul.f32 %v448_v36, %v3801_v60  ;;  %v3821_v26 = vld [vmem:[#allocation2 + $0x8] sm:$0xf] }
  0xb0   :  { %v502_v7 = vadd.f32 %v486_v37, %v322_v53  ;;  %v506_v22 = vadd.f32 %v490_v3, %v326_v55  ;;  %v501_v23 = vadd.f32 %v485_v4, %v321_v46  ;;  %v505_v33 = vadd.f32 %v489_v35, %v325_v57  ;;  %v3219_v55 = vld [vmem:[#allocation5 + $0x114] ss:$8 sps:$4 sm:$0xff]   ;;  %v3217_v35 = vld [vmem:[#allocation5 + $0x110] ss:$8 sps:$4 sm:$0xff]  }
  0xb1   :  { %v504_v38 = vadd.f32 %v488_v40, %v324_v61  ;;  %v508_v45 = vadd.f32 %v492_v47, %v328_v63  ;;  %v3817_v42 = vadd.f32 %v487_v39, %v323_v58  ;;  %v3819_v54 = vadd.f32 %v491_v1, %v327_v59  ;;  %v3222_v61 = vld [vmem:[#allocation5 + $0x314] ss:$8 sps:$4 sm:$0xff]   ;;  %v3220_v1 = vld [vmem:[#allocation5 + $0x310] ss:$8 sps:$4 sm:$0xff]  }
  0xb2   :  { %vm518_vm0 = vcmp.gt.f32.partialorder %v502_v7, 0.0  ;;  %v534_v62 = vmul.f32 0.2, %v502_v7  ;;  %vm522_vm1 = vcmp.gt.f32.partialorder %v506_v22, 0.0  ;;  %v538_v0 = vmul.f32 0.2, %v506_v22 }
  0xb3   :  { %vm517_vm2 = vcmp.gt.f32.partialorder %v501_v23, 0.0  ;;  %v533_v27 = vmul.f32 0.2, %v501_v23  ;;  %vm521_vm3 = vcmp.gt.f32.partialorder %v505_v33, 0.0  ;;  %v537_v31 = vmul.f32 0.2, %v505_v33 }
  0xb4   :  { %v550_v36 = vsel %vm518_vm0, %v502_v7, %v534_v62  ;;  %v554_v43 = vsel %vm522_vm1, %v506_v22, %v538_v0  ;;  %vm520_vm4 = vcmp.gt.f32.partialorder %v504_v38, 0.0  ;;  %v536_v44 = vmul.f32 0.2, %v504_v38  ;;  %v3228_v7 = vld [vmem:[#allocation5 + $0x324] ss:$8 sps:$4 sm:$0xff]  }
  0xb5   :  { %v566_v49 = vpack.c.bf16 %v550_v36, %v550_v36  ;;  %v570_v51 = vpack.c.bf16 %v554_v43, %v554_v43  ;;  %v549_v52 = vsel %vm517_vm2, %v501_v23, %v533_v27  ;;  %v553_v53 = vsel %vm521_vm3, %v505_v33, %v537_v31 }
  0xb6   :  { %v565_v46 = vpack.c.bf16 %v549_v52, %v549_v52  ;;  %v569_v57 = vpack.c.bf16 %v553_v53, %v553_v53  ;;  %v552_v58 = vsel %vm520_vm4, %v504_v38, %v536_v44  ;;  %vm524_vm5 = vcmp.gt.f32.partialorder %v508_v45, 0.0 }
  0xb7   :  { %1237 = vmatprep.mubr.bf16.mxu0 %v566_v49  ;;  %1639 = vmatprep.mubr.bf16.mxu1 %v570_v51  ;;  %v540_v59 = vmul.f32 0.2, %v508_v45  ;;  %v276_v63 = vrot.slane %v3821_v26, %v3719_v30  ;;  %v456_v37 = vrot.slane %v376_v56, %v3714_v28  ;;  %v292_v3 = vrot.slane %v3823_v48, %v3719_v30  ;;  %v3225_v56 = vld [vmem:[#allocation5 + $0x124] ss:$8 sps:$4 sm:$0xff]   ;;  %v3229_v49 = vld [vmem:[#allocation5 + $0x130] ss:$8 sps:$4 sm:$0xff]  }
  0xb8   :  { %1238 = vmatmul.mubr.bf16.vlgmr.msra.gmra.mrb[0].mxu0 %v565_v46  ;;  %1640 = vmatmul.mubr.bf16.vlgmr.msra.gmra.mrb[0].mxu1 %v569_v57  ;;  %v568_v4 = vpack.c.bf16 %v552_v58, %v552_v58  ;;  %v472_v40 = vrot.slane %v392_v41, %v3714_v28  ;;  %v204_v47 = vrot.slane %v124_v14, %v3719_v30  ;;  %v3223_v14 = vld [vmem:[#allocation5 + $0x120] ss:$8 sps:$4 sm:$0xff]   ;;  %v3232_v51 = vld [vmem:[#allocation5 + $0x330] ss:$8 sps:$4 sm:$0xff]   ;;  %v3240_v46 = vld [vmem:[#allocation5 + $0x344] ss:$8 sps:$4 sm:$0xff]  }
  0xb9   :  { %1247 = vmatpush1.bf16.msra.mxu0 %v3211_v50  ;;  %1649 = vmatpush1.bf16.msra.mxu1 %v3214_v29  ;;  %v556_v39 = vsel %vm524_vm5, %v508_v45, %v540_v59  ;;  %v468_v22 = vrot.slane %v388_v15, %v3714_v28  ;;  %v288_v41 = vrot.slane %v3821_v26, %v3709_v25  ;;  %v3226_v45 = vld [vmem:[#allocation5 + $0x320] ss:$8 sps:$4 sm:$0xff]   ;;  %vm519_vm6 = vcmp.gt.f32.partialorder %v3817_v42, 0.0 }
  0xba   :  { %1278 = vmatprep.mubr.bf16.mxu0 %v568_v4  ;;  %v572_v23 = vpack.c.bf16 %v556_v39, %v556_v39  ;;  %1248 = vmatprep.subr.bf16.mxu0 %v3219_v55  ;;  %v329_v33 = vadd.f32 %v276_v63, %v3804_v2  ;;  %v220_v38 = vrot.slane %v140_v16, %v3719_v30  ;;  %v3231_v16 = vld [vmem:[#allocation5 + $0x134] ss:$8 sps:$4 sm:$0xff]   ;;  %v3237_v55 = vld [vmem:[#allocation5 + $0x144] ss:$8 sps:$4 sm:$0xff]   ;;  %v3238_v57 = vld [vmem:[#allocation5 + $0x340] ss:$8 sps:$4 sm:$0xff]  }
  0xbb   :  { %1650 = vmatprep.subr.bf16.mxu1 %v3222_v61  ;;  %v493_v62 = vmul.f32 %v456_v37, %v3801_v60  ;;  %v333_v15 = vadd.f32 %v292_v3, %v3807_v34  ;;  %v497_v0 = vmul.f32 %v472_v40, %v3801_v60  ;;  %v232_v27 = vmul.f32 %v204_v47, %v3782_v32  ;;  %v3234_v34 = vld [vmem:[#allocation5 + $0x334] ss:$8 sps:$4 sm:$0xff]   ;;  %v3244_v40 = vld [vmem:[#allocation5 + $0x350] ss:$8 sps:$4 sm:$0xff]  }
  0xbc   :  { %1680 = vmatprep.mubr.bf16.mxu1 %v572_v23  ;;  %v496_v31 = vmul.f32 %v468_v22, %v3801_v60  ;;  %v304_v2 = vrot.slane %v3823_v48, %v3709_v25  ;;  %v236_v50 = vmul.f32 %v220_v38, %v3782_v32  ;;  %v200_v29 = vrot.slane %v120_v18, %v3719_v30  ;;  %v3243_v37 = vld [vmem:[#allocation5 + $0x154] ss:$8 sps:$4 sm:$0xff]   ;;  %v3247_v22 = vld [vmem:[#allocation5 + $0x160] ss:$8 sps:$4 sm:$0xff]   ;;  %v3256_v38 = vld [vmem:[#allocation5 + $0x370] ss:$8 sps:$4 sm:$0xff]  }
  0xbd   :  { %1249 = vmatpush1.bf16.msra.mxu0 %v3217_v35  ;;  %1651 = vmatpush1.bf16.msra.mxu1 %v3220_v1  ;;  %v3858_v36 = vadd.f32 %v493_v62, %v329_v33  ;;  %v3860_v43 = vadd.f32 %v497_v0, %v333_v15  ;;  %v332_v44 = vadd.f32 %v288_v41, %v232_v27  ;;  %v3246_v3 = vld [vmem:[#allocation5 + $0x354] ss:$8 sps:$4 sm:$0xff]   ;;  %v3241_v35 = vld [vmem:[#allocation5 + $0x150] ss:$8 sps:$4 sm:$0xff]   ;;  %v3250_v23 = vld [vmem:[#allocation5 + $0x360] ss:$8 sps:$4 sm:$0xff]  }
  0xbe   :  { %1250 = vmatprep.subr.bf16.mxu0 %v3225_v56  ;;  %1652 = vmatprep.subr.bf16.mxu1 %v3228_v7  ;;  %v336_v53 = vadd.f32 %v304_v2, %v236_v50  ;;  %v480_v18 = vrot.slane %v400_v21, %v3714_v28  ;;  %v500_v19 = vmul.f32 %v484_v8, %v3801_v60  ;;  %v3249_v56 = vld [vmem:[#allocation5 + $0x164] ss:$8 sps:$4 sm:$0xff]   ;;  %v3255_v41 = vld [vmem:[#allocation5 + $0x174] ss:$8 sps:$4 sm:$0xff]   ;;  %v3253_v33 = vld [vmem:[#allocation5 + $0x170] ss:$8 sps:$4 sm:$0xff]  }
  0xbf   :  { %v3875_v52 = vadd.f32 %v496_v31, %v332_v44  ;;  %v284_v12 = vrot.slane %v3821_v26, %v3706_v24  ;;  %v300_v58 = vrot.slane %v3823_v48, %v3706_v24  ;;  %v231_v61 = vmul.f32 %v200_v29, %v3782_v32  ;;  %v3252_v7 = vld [vmem:[#allocation5 + $0x364] ss:$8 sps:$4 sm:$0xff]   ;;  %v3259_v15 = vld [vmem:[#allocation5 + $0x180] ss:$8 sps:$4 sm:$0xff]   ;;  %v3267_v27 = vld [vmem:[#allocation5 + $0x194] ss:$8 sps:$4 sm:$0xff]  }
  0xc0   :  { %v3886_v59 = vadd.f32 %v500_v19, %v336_v53  ;;  %v495_v13 = vmul.f32 %v464_v9, %v3801_v60  ;;  %v235_v21 = vmul.f32 %v216_v17, %v3782_v32  ;;  %v499_v63 = vmul.f32 %v480_v18, %v3801_v60  ;;  %v3264_v62 = vld [vmem:[#allocation5 + $0x384] ss:$8 sps:$4 sm:$0xff]   ;;  %v3262_v0 = vld [vmem:[#allocation5 + $0x380] ss:$8 sps:$4 sm:$0xff]   ;;  %v3270_v31 = vld [vmem:[#allocation5 + $0x394] ss:$8 sps:$4 sm:$0xff]  }
  0xc1   :  { %1251 = vmatpush1.bf16.msra.mxu0 %v3223_v14  ;;  %1653 = vmatpush1.bf16.msra.mxu1 %v3226_v45  ;;  %v331_v4 = vadd.f32 %v284_v12, %v231_v61  ;;  %v3258_v14 = vld [vmem:[#allocation5 + $0x374] ss:$8 sps:$4 sm:$0xff]   ;;  %v3261_v45 = vld [vmem:[#allocation5 + $0x184] ss:$8 sps:$4 sm:$0xff]   ;;  %v3265_v2 = vld [vmem:[#allocation5 + $0x190] ss:$8 sps:$4 sm:$0xff]   ;;  %v116_v29 = vrot.slane %v3676_v10, %v3706_v24  ;;  %v132_v9 = vrot.slane %v3678_v11, %v3706_v24 }
  0xc2   :  { %1252 = vmatprep.subr.bf16.mxu0 %v3231_v16  ;;  %1654 = vmatprep.subr.bf16.mxu1 %v3234_v34  ;;  %v335_v47 = vadd.f32 %v300_v58, %v235_v21  ;;  %v3268_v8 = vld [vmem:[#allocation5 + $0x390] ss:$8 sps:$4 sm:$0xff]   ;;  %v3273_v16 = vld [vmem:[#allocation5 + $0x1a4] ss:$8 sps:$4 sm:$0xff]   ;;  %v3271_v44 = vld [vmem:[#allocation5 + $0x1a0] ss:$8 sps:$4 sm:$0xff]   ;;  %v380_v17 = vrot.slane %v3676_v10, %v3709_v25 }
  0xc3   :  { %v3892_v39 = vadd.f32 %v495_v13, %v331_v4  ;;  %v3276_v34 = vld [vmem:[#allocation5 + $0x3a4] ss:$8 sps:$4 sm:$0xff]   ;;  %v3279_v50 = vld [vmem:[#allocation5 + $0x1b4] ss:$8 sps:$4 sm:$0xff]   ;;  %v3277_v53 = vld [vmem:[#allocation5 + $0x1b0] ss:$8 sps:$4 sm:$0xff]   ;;  %v196_v12 = vrot.slane %v116_v29, %v3719_v30 }
  0xc4   :  { %v3894_v1 = vadd.f32 %v499_v63, %v335_v47  ;;  %v3280_v18 = vld [vmem:[#allocation5 + $0x3b0] ss:$8 sps:$4 sm:$0xff]   ;;  %v3288_v19 = vld [vmem:[#allocation5 + $0x3c4] ss:$8 sps:$4 sm:$0xff]   ;;  %v3283_v10 = vld [vmem:[#allocation5 + $0x1c0] ss:$8 sps:$4 sm:$0xff]   ;;  %v280_v63 = vrot.slane %v3821_v26, %v3714_v28 }
  0xc5   :  { %1253 = vmatpush1.bf16.msra.mxu0 %v3229_v49  ;;  %1655 = vmatpush1.bf16.msra.mxu1 %v3232_v51  ;;  %v3274_v49 = vld [vmem:[#allocation5 + $0x3a0] ss:$8 sps:$4 sm:$0xff]   ;;  %v3282_v51 = vld [vmem:[#allocation5 + $0x3b4] ss:$8 sps:$4 sm:$0xff]   ;;  %v230_v21 = vmul.f32 %v196_v12, %v3782_v32  ;;  %vm523_vm7 = vcmp.gt.f32.partialorder %v3819_v54, 0.0  ;;  %vm525_vm10 = vcmp.gt.f32.partialorder %v3858_v36, 0.0 }
  0xc6   :  { %1254 = vmatprep.subr.bf16.mxu0 %v3237_v55  ;;  %1656 = vmatprep.subr.bf16.mxu1 %v3240_v46  ;;  %v396_v55 = vrot.slane %v3678_v11, %v3709_v25  ;;  %v3285_v46 = vld [vmem:[#allocation5 + $0x1c4] ss:$8 sps:$4 sm:$0xff]   ;;  %v3286_v58 = vld [vmem:[#allocation5 + $0x3c0] ss:$8 sps:$4 sm:$0xff]   ;;  %v3291_v13 = vld [vmem:[#allocation5 + $0x1d4] ss:$8 sps:$4 sm:$0xff]  }
  0xc7   :  { %v3294_v11 = vld [vmem:[#allocation5 + $0x3d4] ss:$8 sps:$4 sm:$0xff]   ;;  %vm529_vm11 = vcmp.gt.f32.partialorder %v3860_v43, 0.0  ;;  %vm528_vm12 = vcmp.gt.f32.partialorder %v3875_v52, 0.0  ;;  %vm532_vm13 = vcmp.gt.f32.partialorder %v3886_v59, 0.0  ;;  %vm527_vm14 = vcmp.gt.f32.partialorder %v3892_v39, 0.0 }
  0xc8   :  { %v476_v61 = vrot.slane %v396_v55, %v3714_v28  ;;  %v3324_v55 = vld [vmem:[#allocation5 + $0x624] ss:$8 sps:$4 sm:$0xff]   ;;  %v3327_v12 = vld [vmem:[#allocation5 + $0x434] ss:$8 sps:$4 sm:$0xff]   ;;  %vm531_vm15 = vcmp.gt.f32.partialorder %v3894_v1, 0.0 }
  0xc9   :  { %1255 = vmatpush1.bf16.msra.mxu0 %v3235_v20  ;;  %1657 = vmatpush1.bf16.msra.mxu1 %v3238_v57  ;;  %v212_v20 = vrot.slane %v132_v9, %v3719_v30  ;;  %v460_v57 = vrot.slane %v380_v17, %v3714_v28  ;;  %v3315_v9 = vld [vmem:[#allocation5 + $0x414] ss:$8 sps:$4 sm:$0xff]  }
  0xca   :  { %1256 = vmatprep.subr.bf16.mxu0 %v3243_v37  ;;  %1658 = vmatprep.subr.bf16.mxu1 %v3246_v3  ;;  %v296_v3 = vrot.slane %v3823_v48, %v3714_v28  ;;  %v498_v47 = vmul.f32 %v476_v61, %v3801_v60  ;;  %v3318_v17 = vld [vmem:[#allocation5 + $0x614] ss:$8 sps:$4 sm:$0xff]   ;;  %v3336_v61 = vld [vmem:[#allocation5 + $0x644] ss:$8 sps:$4 sm:$0xff]  }
  0xcb   :  { %v234_v37 = vmul.f32 %v212_v20, %v3782_v32  ;;  %v494_v4 = vmul.f32 %v460_v57, %v3801_v60  ;;  %v3295_v32 = vld [vmem:[#allocation5 + $0x1e0] ss:$8 sps:$4 sm:$0xff]   ;;  %v539_v60 = vmul.f32 0.2, %v3819_v54  ;;  %v3330_v20 = vld [vmem:[#allocation5 + $0x634] ss:$8 sps:$4 sm:$0xff]  }
  0xcc   :  { %v3325_v57 = vld [vmem:[#allocation5 + $0x430] ss:$8 sps:$4 sm:$0xff]  }
  0xcd   :  { %1257 = vmatpush1.bf16.msra.mxu0 %v3241_v35  ;;  %1659 = vmatpush1.bf16.msra.mxu1 %v3244_v40  ;;  %v3289_v35 = vld [vmem:[#allocation5 + $0x1d0] ss:$8 sps:$4 sm:$0xff]  }
  0xce   :  { %1258 = vmatprep.subr.bf16.mxu0 %v3249_v56  ;;  %1660 = vmatprep.subr.bf16.mxu1 %v3252_v7  ;;  %v3292_v40 = vld [vmem:[#allocation5 + $0x3d0] ss:$8 sps:$4 sm:$0xff]   ;;  %v3297_v56 = vld [vmem:[#allocation5 + $0x1e4] ss:$8 sps:$4 sm:$0xff]  }
  0xcf   :  { %v3300_v7 = vld [vmem:[#allocation5 + $0x3e4] ss:$8 sps:$4 sm:$0xff]  }
  0xd1   :  { %1259 = vmatpush1.bf16.msra.mxu0 %v3247_v22  ;;  %1661 = vmatpush1.bf16.msra.mxu1 %v3250_v23  ;;  %v330_v22 = vadd.f32 %v280_v63, %v230_v21  ;;  %v334_v23 = vadd.f32 %v296_v3, %v234_v37  ;;  %v3339_v21 = vld [vmem:[#allocation5 + $0x454] ss:$8 sps:$4 sm:$0xff]   ;;  %v3337_v37 = vld [vmem:[#allocation5 + $0x450] ss:$8 sps:$4 sm:$0xff]  }
  0xd2   :  { %1260 = vmatprep.subr.bf16.mxu0 %v3255_v41  ;;  %1662 = vmatprep.subr.bf16.mxu1 %v3258_v14  ;;  %v3298_v41 = vld [vmem:[#allocation5 + $0x3e0] ss:$8 sps:$4 sm:$0xff]   ;;  %v3303_v14 = vld [vmem:[#allocation5 + $0x1f4] ss:$8 sps:$4 sm:$0xff]   ;;  %v3340_v3 = vld [vmem:[#allocation5 + $0x650] ss:$8 sps:$4 sm:$0xff]  }
  0xd3   :  { %v510_v26 = vadd.f32 %v494_v4, %v330_v22  ;;  %v514_v48 = vadd.f32 %v498_v47, %v334_v23  ;;  %v3342_v63 = vld [vmem:[#allocation5 + $0x654] ss:$8 sps:$4 sm:$0xff]   ;;  %v3345_v4 = vld [vmem:[#allocation5 + $0x464] ss:$8 sps:$4 sm:$0xff]   ;;  %v3346_v47 = vld [vmem:[#allocation5 + $0x660] ss:$8 sps:$4 sm:$0xff]  }
  0xd4   :  { %v3349_v22 = vld [vmem:[#allocation5 + $0x470] ss:$8 sps:$4 sm:$0xff]  }
  0xd5   :  { %1261 = vmatpush1.bf16.msra.mxu0 %v3253_v33  ;;  %1663 = vmatpush1.bf16.msra.mxu1 %v3256_v38  ;;  %v3306_v33 = vld [vmem:[#allocation5 + $0x3f4] ss:$8 sps:$4 sm:$0xff]   ;;  %v535_v38 = vmul.f32 0.2, %v3817_v42  ;;  %vm526_vm8 = vcmp.gt.f32.partialorder %v510_v26, 0.0  ;;  %vm530_vm9 = vcmp.gt.f32.partialorder %v514_v48, 0.0 }
  0xd6   :  { %1262 = vmatprep.subr.bf16.mxu0 %v3261_v45  ;;  %1664 = vmatprep.subr.bf16.mxu1 %v3264_v62  ;;  %v3301_v45 = vld [vmem:[#allocation5 + $0x1f0] ss:$8 sps:$4 sm:$0xff]   ;;  %v542_v62 = vmul.f32 0.2, %v510_v26 }
  0xd7   :  { %v3352_v23 = vld [vmem:[#allocation5 + $0x670] ss:$8 sps:$4 sm:$0xff]  }
  0xd9   :  { %1263 = vmatpush1.bf16.msra.mxu0 %v3259_v15  ;;  %1665 = vmatpush1.bf16.msra.mxu1 %v3262_v0  ;;  %v3304_v15 = vld [vmem:[#allocation5 + $0x3f0] ss:$8 sps:$4 sm:$0xff]   ;;  %v546_v0 = vmul.f32 0.2, %v514_v48 }
  0xda   :  { %1264 = vmatprep.subr.bf16.mxu0 %v3267_v27  ;;  %1666 = vmatprep.subr.bf16.mxu1 %v3270_v31  ;;  %v3309_v27 = vld [vmem:[#allocation5 + $0x404] ss:$8 sps:$4 sm:$0xff]  }
  0xdb   :  { %v3312_v31 = vld [vmem:[#allocation5 + $0x604] ss:$8 sps:$4 sm:$0xff]  }
  0xdd   :  { %1265 = vmatpush1.bf16.msra.mxu0 %v3265_v2  ;;  %1667 = vmatpush1.bf16.msra.mxu1 %v3268_v8  ;;  %v551_v2 = vsel %vm519_vm6, %v3817_v42, %v535_v38  ;;  %v555_v8 = vsel %vm523_vm7, %v3819_v54, %v539_v60  ;;  %v3313_v42 = vld [vmem:[#allocation5 + $0x410] ss:$8 sps:$4 sm:$0xff]  }
  0xde   :  { %1266 = vmatprep.subr.bf16.mxu0 %v3273_v16  ;;  %1668 = vmatprep.subr.bf16.mxu1 %v3276_v34  ;;  %v558_v16 = vsel %vm526_vm8, %v510_v26, %v542_v62  ;;  %v3307_v34 = vld [vmem:[#allocation5 + $0x400] ss:$8 sps:$4 sm:$0xff]   ;;  %v3316_v54 = vld [vmem:[#allocation5 + $0x610] ss:$8 sps:$4 sm:$0xff]   ;;  %v3357_v26 = vld [vmem:[#allocation5 + $0x484] ss:$8 sps:$4 sm:$0xff]  }
  0xdf   :  { %v574_v29 = vpack.c.bf16 %v558_v16, %v558_v16  ;;  %v3361_v38 = vld [vmem:[#allocation5 + $0x490] ss:$8 sps:$4 sm:$0xff]   ;;  %v3372_v62 = vld [vmem:[#allocation5 + $0x6a4] ss:$8 sps:$4 sm:$0xff]   ;;  %v3378_v16 = vld [vmem:[#allocation5 + $0x6b4] ss:$8 sps:$4 sm:$0xff]  }
  0xe0   :  { %v3364_v60 = vld [vmem:[#allocation5 + $0x690] ss:$8 sps:$4 sm:$0xff]   ;;  %vm2783_vm8 = vcmask 1041409  }
  0xe1   :  { %1267 = vmatpush1.bf16.msra.mxu0 %v3271_v44  ;;  %1669 = vmatpush1.bf16.msra.mxu1 %v3274_v49  ;;  %v562_v44 = vsel %vm530_vm9, %v514_v48, %v546_v0  ;;  %v567_v49 = vpack.c.bf16 %v551_v2, %v551_v2  ;;  %v3358_v48 = vld [vmem:[#allocation5 + $0x680] ss:$8 sps:$4 sm:$0xff]   ;;  %v3595_v0 = vmov 1966171168   ;;  %v3375_v2 = vld [vmem:[#allocation5 + $0x4b4] ss:$8 sps:$4 sm:$0xff]  }
  0xe2   :  { %1268 = vmatprep.subr.bf16.mxu0 %v3279_v50  ;;  %1670 = vmatprep.subr.bf16.mxu1 %v3282_v51  ;;  %v571_v50 = vpack.c.bf16 %v555_v8, %v555_v8  ;;  %v3310_v51 = vld [vmem:[#allocation5 + $0x600] ss:$8 sps:$4 sm:$0xff]   ;;  %v2628_v8 = vpop.permute.xlu1 %2627  ;;  %vm2785_vm9 = vcmask 1042434  }
  0xe5   :  { %1269 = vmatpush1.bf16.msra.mxu0 %v3277_v53  ;;  %1671 = vmatpush1.bf16.msra.mxu1 %v3280_v18  ;;  %v578_v53 = vpack.c.bf16 %v562_v44, %v562_v44  ;;  %v3321_v18 = vld [vmem:[#allocation5 + $0x424] ss:$8 sps:$4 sm:$0xff]   ;;  %v2633_v44 = vrot.slane %v2628_v8, %v3719_v30 }
  0xe6   :  { %1270 = vmatprep.subr.bf16.mxu0 %v3285_v46  ;;  %1672 = vmatprep.subr.bf16.mxu1 %v3288_v19  ;;  %v3319_v46 = vld [vmem:[#allocation5 + $0x420] ss:$8 sps:$4 sm:$0xff]  }
  0xe7   :  { %v3322_v19 = vld [vmem:[#allocation5 + $0x620] ss:$8 sps:$4 sm:$0xff]  }
  0xe9   :  { %1271 = vmatpush1.bf16.msra.mxu0 %v3283_v10  ;;  %1673 = vmatpush1.bf16.msra.mxu1 %v3286_v58  ;;  %v3328_v10 = vld [vmem:[#allocation5 + $0x630] ss:$8 sps:$4 sm:$0xff]   ;;  %v3333_v58 = vld [vmem:[#allocation5 + $0x444] ss:$8 sps:$4 sm:$0xff]  }
  0xea   :  { %1272 = vmatprep.subr.bf16.mxu0 %v3291_v13  ;;  %1674 = vmatprep.subr.bf16.mxu1 %v3294_v11  ;;  %v3331_v13 = vld [vmem:[#allocation5 + $0x440] ss:$8 sps:$4 sm:$0xff]  }
  0xeb   :  { %v3334_v11 = vld [vmem:[#allocation5 + $0x640] ss:$8 sps:$4 sm:$0xff]  }
  0xed   :  { %1273 = vmatpush1.bf16.msra.mxu0 %v3289_v35  ;;  %1675 = vmatpush1.bf16.msra.mxu1 %v3292_v40  ;;  %v3348_v35 = vld [vmem:[#allocation5 + $0x664] ss:$8 sps:$4 sm:$0xff]   ;;  %v3343_v40 = vld [vmem:[#allocation5 + $0x460] ss:$8 sps:$4 sm:$0xff]  }
  0xee   :  { %1274 = vmatprep.subr.bf16.mxu0 %v3297_v56  ;;  %1676 = vmatprep.subr.bf16.mxu1 %v3300_v7  ;;  %v3351_v56 = vld [vmem:[#allocation5 + $0x474] ss:$8 sps:$4 sm:$0xff]  }
  0xef   :  { %v3354_v7 = vld [vmem:[#allocation5 + $0x674] ss:$8 sps:$4 sm:$0xff]  }
  0xf1   :  { %1275 = vmatpush1.bf16.msra.mxu0 %v3295_v32  ;;  %1677 = vmatpush1.bf16.msra.mxu1 %v3298_v41  ;;  %v3360_v32 = vld [vmem:[#allocation5 + $0x684] ss:$8 sps:$4 sm:$0xff]   ;;  %v3355_v41 = vld [vmem:[#allocation5 + $0x480] ss:$8 sps:$4 sm:$0xff]  }
  0xf2   :  { %1276 = vmatprep.subr.bf16.mxu0 %v3303_v14  ;;  %1678 = vmatprep.subr.bf16.mxu1 %v3306_v33  ;;  %v3363_v14 = vld [vmem:[#allocation5 + $0x494] ss:$8 sps:$4 sm:$0xff]  }
  0xf3   :  { %v3366_v33 = vld [vmem:[#allocation5 + $0x694] ss:$8 sps:$4 sm:$0xff]  }
  0xf5   :  { %1277 = vmatpush1.bf16.msra.mxu0 %v3301_v45  ;;  %1679 = vmatpush1.bf16.msra.mxu1 %v3304_v15  ;;  %v3369_v45 = vld [vmem:[#allocation5 + $0x4a4] ss:$8 sps:$4 sm:$0xff]   ;;  %v3367_v15 = vld [vmem:[#allocation5 + $0x4a0] ss:$8 sps:$4 sm:$0xff]  }
  0xf6   :  { %2009 = vmatprep.subr.bf16.mxu0 %v3309_v27  ;;  %2411 = vmatprep.subr.bf16.mxu1 %v3312_v31  ;;  %v2668_v27 = vunpack.c.l.s4 %v3595_v0  ;;  %v3370_v31 = vld [vmem:[#allocation5 + $0x6a0] ss:$8 sps:$4 sm:$0xff]  }
  0xf8   :  { %1279 = vmatmul.mubr.bf16.vlgmr.msra.gmra.mrb[0].mxu0 %v567_v49  ;;  %1681 = vmatmul.mubr.bf16.vlgmr.msra.gmra.mrb[0].mxu1 %v571_v50  ;;  %v2669_v49 = vunpack.c.0.s8 %v2668_v27  ;;  %v3376_v50 = vld [vmem:[#allocation5 + $0x6b0] ss:$8 sps:$4 sm:$0xff]  }
  0xf9   :  { %2010 = vmatpush1.bf16.msra.mxu0 %v3307_v34  ;;  %2041 = vmatprep.mubr.bf16.mxu0 %v574_v29  ;;  %v3373_v34 = vld [vmem:[#allocation5 + $0x4b0] ss:$8 sps:$4 sm:$0xff]   ;;  %v2637_v29 = vpop.permute.xlu1 %2636 }
  0xfa   :  { %2412 = vmatpush1.bf16.msra.mxu1 %v3310_v51  ;;  %2443 = vmatprep.mubr.bf16.mxu1 %v578_v53  ;;  %v3381_v51 = vld [vmem:[#allocation5 + $0x4c4] ss:$8 sps:$4 sm:$0xff]   ;;  %v3379_v53 = vld [vmem:[#allocation5 + $0x4c0] ss:$8 sps:$4 sm:$0xff]  }
  0xfb   :  { %2011 = vmatprep.subr.bf16.mxu0 %v3315_v9  ;;  %2413 = vmatprep.subr.bf16.mxu1 %v3318_v17  ;;  %v3384_v9 = vld [vmem:[#allocation5 + $0x6c4] ss:$8 sps:$4 sm:$0xff]   ;;  %v2642_v17 = vrot.slane %v2637_v29, %v3719_v30  ;;  %v3424_v29 = vld [vmem:[#allocation5 + $0x730] ss:$8 sps:$4 sm:$0xff]  }
  0xfd   :  { %2012 = vmatpush1.bf16.msra.mxu0 %v3313_v42  ;;  %v2672_v42 = vsub.s32 %v2669_v49, %v3665_v6  ;;  %v3423_v49 = vld [vmem:[#allocation5 + $0x534] ss:$8 sps:$4 sm:$0xff]  }
  0xfe   :  { %2414 = vmatpush1.bf16.msra.mxu1 %v3316_v54  ;;  %2013 = vmatprep.subr.bf16.mxu0 %v3321_v18  ;;  %v2665_v54 = vcombine.low %v2633_v44, %v2642_v17  ;;  %v3382_v18 = vld [vmem:[#allocation5 + $0x6c0] ss:$8 sps:$4 sm:$0xff]   ;;  %v3432_v17 = vld [vmem:[#allocation5 + $0x744] ss:$8 sps:$4 sm:$0xff]  }
  0xff   :  { %2415 = vmatprep.subr.bf16.mxu1 %v3324_v55  ;;  %v3387_v55 = vld [vmem:[#allocation5 + $0x4d4] ss:$8 sps:$4 sm:$0xff]   ;;  %v3418_v44 = vld [vmem:[#allocation5 + $0x720] ss:$8 sps:$4 sm:$0xff]  }
 0x101   :  { %2014 = vmatpush1.bf16.msra.mxu0 %v3319_v46  ;;  %v2646_v46 = vpop.permute.xlu1 %2645 }
 0x102   :  { %2416 = vmatpush1.bf16.msra.mxu1 %v3322_v19  ;;  %2015 = vmatprep.subr.bf16.mxu0 %v3327_v12  ;;  %v2655_v19 = vpop.permute.xlu0 %2654  ;;  %v3390_v12 = vld [vmem:[#allocation5 + $0x6d4] ss:$8 sps:$4 sm:$0xff]  }
 0x103   :  { %2417 = vmatprep.subr.bf16.mxu1 %v3330_v20  ;;  %v2651_v20 = vrot.slane %v2646_v46, %v3719_v30  ;;  %v3436_v46 = vld [vmem:[#allocation5 + $0x750] ss:$8 sps:$4 sm:$0xff]  }
 0x105   :  { %2016 = vmatpush1.bf16.msra.mxu0 %v3325_v57  ;;  %v2660_v57 = vrot.slane %v2655_v19, %v3719_v30  ;;  %v3441_v19 = vld [vmem:[#allocation5 + $0x564] ss:$8 sps:$4 sm:$0xff]  }
 0x106   :  { %2418 = vmatpush1.bf16.msra.mxu1 %v3328_v10  ;;  %2017 = vmatprep.subr.bf16.mxu0 %v3333_v58  ;;  %v3385_v10 = vld [vmem:[#allocation5 + $0x4d0] ss:$8 sps:$4 sm:$0xff]   ;;  %v2673_v58 = vrot.slane %v2665_v54, %v2672_v42  ;;  %v3435_v54 = vld [vmem:[#allocation5 + $0x554] ss:$8 sps:$4 sm:$0xff]  }
 0x107   :  { %2419 = vmatprep.subr.bf16.mxu1 %v3336_v61  ;;  %v2666_v61 = vcombine.low %v2651_v20, %v2660_v57  ;;  %v3439_v20 = vld [vmem:[#allocation5 + $0x560] ss:$8 sps:$4 sm:$0xff]  }
 0x108   :  { %v3442_v57 = vld [vmem:[#allocation5 + $0x760] ss:$8 sps:$4 sm:$0xff]  }
 0x109   :  { %2018 = vmatpush1.bf16.msra.mxu0 %v3331_v13  ;;  %v3388_v13 = vld [vmem:[#allocation5 + $0x6d0] ss:$8 sps:$4 sm:$0xff]  }
 0x10a   :  { %2420 = vmatpush1.bf16.msra.mxu1 %v3334_v11  ;;  %2019 = vmatprep.subr.bf16.mxu0 %v3339_v21  ;;  %v3393_v11 = vld [vmem:[#allocation5 + $0x4e4] ss:$8 sps:$4 sm:$0xff]  }
 0x10b   :  { %2421 = vmatprep.subr.bf16.mxu1 %v3342_v63  ;;  %v3396_v21 = vld [vmem:[#allocation5 + $0x6e4] ss:$8 sps:$4 sm:$0xff]   ;;  %v2680_v63 = vrot.slane %v2666_v61, %v2672_v42  ;;  %v3445_v61 = vld [vmem:[#allocation5 + $0x570] ss:$8 sps:$4 sm:$0xff]  }
 0x10d   :  { %2020 = vmatpush1.bf16.msra.mxu0 %v3337_v37  ;;  %v3391_v37 = vld [vmem:[#allocation5 + $0x4e0] ss:$8 sps:$4 sm:$0xff]  }
 0x10e   :  { %2422 = vmatpush1.bf16.msra.mxu1 %v3340_v3  ;;  %2021 = vmatprep.subr.bf16.mxu0 %v3345_v4  ;;  %v2681_v3 = vcombine.low %v2673_v58, %v2680_v63  ;;  %v3394_v4 = vld [vmem:[#allocation5 + $0x6e0] ss:$8 sps:$4 sm:$0xff]   ;;  %v3450_v58 = vld [vmem:[#allocation5 + $0x774] ss:$8 sps:$4 sm:$0xff]  }
 0x10f   :  { %2423 = vmatprep.subr.bf16.mxu1 %v3348_v35  ;;  %v3399_v35 = vld [vmem:[#allocation5 + $0x4f4] ss:$8 sps:$4 sm:$0xff]   ;;  %v3451_v63 = vld [vmem:[#allocation5 + $0x580] ss:$8 sps:$4 sm:$0xff]  }
 0x111   :  { %2022 = vmatpush1.bf16.msra.mxu0 %v3343_v40  ;;  %v3402_v40 = vld [vmem:[#allocation5 + $0x6f4] ss:$8 sps:$4 sm:$0xff]  }
 0x112   :  { %2424 = vmatpush1.bf16.msra.mxu1 %v3346_v47  ;;  %2023 = vmatprep.subr.bf16.mxu0 %v3351_v56  ;;  %v541_v47 = vmul.f32 0.2, %v3858_v36  ;;  %v3928_v56 = vrot.slane %v2681_v3, %v2672_v42  ;;  %v3430_v42 = vld [vmem:[#allocation5 + $0x740] ss:$8 sps:$4 sm:$0xff]   ;;  %v3459_v3 = vld [vmem:[#allocation5 + $0x594] ss:$8 sps:$4 sm:$0xff]  }
 0x113   :  { %2425 = vmatprep.subr.bf16.mxu1 %v3354_v7  ;;  %v3397_v7 = vld [vmem:[#allocation5 + $0x4f0] ss:$8 sps:$4 sm:$0xff]  }
 0x115   :  { %2024 = vmatpush1.bf16.msra.mxu0 %v3349_v22  ;;  %v545_v22 = vmul.f32 0.2, %v3860_v43 }
 0x116   :  { %2426 = vmatpush1.bf16.msra.mxu1 %v3352_v23  ;;  %2025 = vmatprep.subr.bf16.mxu0 %v3357_v26  ;;  %v3400_v23 = vld [vmem:[#allocation5 + $0x6f0] ss:$8 sps:$4 sm:$0xff]   ;;  %v544_v26 = vmul.f32 0.2, %v3875_v52 }
 0x117   :  { %2427 = vmatprep.subr.bf16.mxu1 %v3360_v32  ;;  %v2692_v32 = vrot.slane %v3928_v56, %v3719_v30 }
 0x119   :  { %2026 = vmatpush1.bf16.msra.mxu0 %v3355_v41  ;;  %v3405_v41 = vld [vmem:[#allocation5 + $0x504] ss:$8 sps:$4 sm:$0xff]   ;;  %2694 = vbcast.lane.b32.xlu1 %v2692_v32, 256  ;;  %v3474_v32 = vld [vmem:[#allocation5 + $0x7b4] ss:$8 sps:$4 sm:$0xff]  }
 0x11a   :  { %2428 = vmatpush1.bf16.msra.mxu1 %v3358_v48  ;;  %2027 = vmatprep.subr.bf16.mxu0 %v3363_v14  ;;  %v548_v48 = vmul.f32 0.2, %v3886_v59  ;;  %v557_v14 = vsel %vm525_vm10, %v3858_v36, %v541_v47  ;;  %v3465_v47 = vld [vmem:[#allocation5 + $0x5a4] ss:$8 sps:$4 sm:$0xff]   ;;  %vm2787_vm10 = vcmask 1043459  }
 0x11b   :  { %2429 = vmatprep.subr.bf16.mxu1 %v3366_v33  ;;  %v3408_v33 = vld [vmem:[#allocation5 + $0x704] ss:$8 sps:$4 sm:$0xff]  }
 0x11c   :  { %v564_v0 = vsel %vm532_vm13, %v3886_v59, %v548_v48  ;;  %v3415_v59 = vld [vmem:[#allocation5 + $0x520] ss:$8 sps:$4 sm:$0xff]   ;;  %v3472_v48 = vld [vmem:[#allocation5 + $0x7b0] ss:$8 sps:$4 sm:$0xff]  }
 0x11d   :  { %2028 = vmatpush1.bf16.msra.mxu0 %v3361_v38  ;;  %v561_v38 = vsel %vm529_vm11, %v3860_v43, %v545_v22  ;;  %v580_v8 = vpack.c.bf16 %v564_v0, %v564_v0  ;;  %v3409_v43 = vld [vmem:[#allocation5 + $0x510] ss:$8 sps:$4 sm:$0xff]   ;;  %v3463_v22 = vld [vmem:[#allocation5 + $0x5a0] ss:$8 sps:$4 sm:$0xff]   ;;  %vm2790_vm11 = vcmask 60416  }
 0x11e   :  { %2430 = vmatpush1.bf16.msra.mxu1 %v3364_v60  ;;  %2029 = vmatprep.subr.bf16.mxu0 %v3369_v45  ;;  %v3403_v60 = vld [vmem:[#allocation5 + $0x500] ss:$8 sps:$4 sm:$0xff]   ;;  %v560_v45 = vsel %vm528_vm12, %v3875_v52, %v544_v26  ;;  %v577_v27 = vpack.c.bf16 %v561_v38, %v561_v38  ;;  %v3417_v52 = vld [vmem:[#allocation5 + $0x524] ss:$8 sps:$4 sm:$0xff]   ;;  %v3471_v26 = vld [vmem:[#allocation5 + $0x5b4] ss:$8 sps:$4 sm:$0xff]  }
 0x11f   :  { %2431 = vmatprep.subr.bf16.mxu1 %v3372_v62  ;;  %v573_v62 = vpack.c.bf16 %v557_v14, %v557_v14  ;;  %v576_v36 = vpack.c.bf16 %v560_v45, %v560_v45  ;;  %v3477_v14 = vld [vmem:[#allocation5 + $0x5c4] ss:$8 sps:$4 sm:$0xff]   ;;  %v3475_v38 = vld [vmem:[#allocation5 + $0x5c0] ss:$8 sps:$4 sm:$0xff]   ;;  %v3483_v45 = vld [vmem:[#allocation5 + $0x5d4] ss:$8 sps:$4 sm:$0xff]  }
 0x120   :  { %v3484_v0 = vld [vmem:[#allocation5 + $0x7d0] ss:$8 sps:$4 sm:$0xff]  }
 0x121   :  { %2030 = vmatpush1.bf16.msra.mxu0 %v3367_v15  ;;  %v3406_v15 = vld [vmem:[#allocation5 + $0x700] ss:$8 sps:$4 sm:$0xff]  }
 0x122   :  { %2432 = vmatpush1.bf16.msra.mxu1 %v3370_v31  ;;  %2031 = vmatprep.subr.bf16.mxu0 %v3375_v2  ;;  %v3411_v31 = vld [vmem:[#allocation5 + $0x514] ss:$8 sps:$4 sm:$0xff]  }
 0x123   :  { %2433 = vmatprep.subr.bf16.mxu1 %v3378_v16  ;;  %v3414_v2 = vld [vmem:[#allocation5 + $0x714] ss:$8 sps:$4 sm:$0xff]   ;;  %v3412_v16 = vld [vmem:[#allocation5 + $0x710] ss:$8 sps:$4 sm:$0xff]  }
 0x125   :  { %2032 = vmatpush1.bf16.msra.mxu0 %v3373_v34  ;;  %v3420_v34 = vld [vmem:[#allocation5 + $0x724] ss:$8 sps:$4 sm:$0xff]  }
 0x126   :  { %2434 = vmatpush1.bf16.msra.mxu1 %v3376_v50  ;;  %2033 = vmatprep.subr.bf16.mxu0 %v3381_v51  ;;  %v3426_v50 = vld [vmem:[#allocation5 + $0x734] ss:$8 sps:$4 sm:$0xff]   ;;  %v3421_v51 = vld [vmem:[#allocation5 + $0x530] ss:$8 sps:$4 sm:$0xff]  }
 0x127   :  { %2435 = vmatprep.subr.bf16.mxu1 %v3384_v9  ;;  %v3429_v9 = vld [vmem:[#allocation5 + $0x544] ss:$8 sps:$4 sm:$0xff]  }
 0x129   :  { %2034 = vmatpush1.bf16.msra.mxu0 %v3379_v53  ;;  %v3427_v53 = vld [vmem:[#allocation5 + $0x540] ss:$8 sps:$4 sm:$0xff]  }
 0x12a   :  { %2436 = vmatpush1.bf16.msra.mxu1 %v3382_v18  ;;  %2035 = vmatprep.subr.bf16.mxu0 %v3387_v55  ;;  %v3438_v18 = vld [vmem:[#allocation5 + $0x754] ss:$8 sps:$4 sm:$0xff]   ;;  %v3433_v55 = vld [vmem:[#allocation5 + $0x550] ss:$8 sps:$4 sm:$0xff]  }
 0x12b   :  { %2437 = vmatprep.subr.bf16.mxu1 %v3390_v12  ;;  %v3444_v12 = vld [vmem:[#allocation5 + $0x764] ss:$8 sps:$4 sm:$0xff]  }
 0x12d   :  { %2036 = vmatpush1.bf16.msra.mxu0 %v3385_v10  ;;  %v3447_v10 = vld [vmem:[#allocation5 + $0x574] ss:$8 sps:$4 sm:$0xff]  }
 0x12e   :  { %2438 = vmatpush1.bf16.msra.mxu1 %v3388_v13  ;;  %2037 = vmatprep.subr.bf16.mxu0 %v3393_v11  ;;  %v3448_v13 = vld [vmem:[#allocation5 + $0x770] ss:$8 sps:$4 sm:$0xff]   ;;  %v3453_v11 = vld [vmem:[#allocation5 + $0x584] ss:$8 sps:$4 sm:$0xff]  }
 0x12f   :  { %2439 = vmatprep.subr.bf16.mxu1 %v3396_v21  ;;  %v3456_v21 = vld [vmem:[#allocation5 + $0x784] ss:$8 sps:$4 sm:$0xff]  }
 0x131   :  { %2038 = vmatpush1.bf16.msra.mxu0 %v3391_v37  ;;  %v3454_v37 = vld [vmem:[#allocation5 + $0x780] ss:$8 sps:$4 sm:$0xff]  }
 0x132   :  { %2440 = vmatpush1.bf16.msra.mxu1 %v3394_v4  ;;  %2039 = vmatprep.subr.bf16.mxu0 %v3399_v35  ;;  %v3462_v4 = vld [vmem:[#allocation5 + $0x794] ss:$8 sps:$4 sm:$0xff]   ;;  %v3457_v35 = vld [vmem:[#allocation5 + $0x590] ss:$8 sps:$4 sm:$0xff]  }
 0x133   :  { %2441 = vmatprep.subr.bf16.mxu1 %v3402_v40  ;;  %v3460_v40 = vld [vmem:[#allocation5 + $0x790] ss:$8 sps:$4 sm:$0xff]  }
 0x135   :  { %2040 = vmatpush1.bf16.msra.mxu0 %v3397_v7  ;;  %v3468_v7 = vld [vmem:[#allocation5 + $0x7a4] ss:$8 sps:$4 sm:$0xff]  }
 0x136   :  { %2442 = vmatpush1.bf16.msra.mxu1 %v3400_v23  ;;  %2050 = vmatprep.subr.bf16.mxu0 %v3405_v41  ;;  %v3466_v23 = vld [vmem:[#allocation5 + $0x7a0] ss:$8 sps:$4 sm:$0xff]   ;;  %v3469_v41 = vld [vmem:[#allocation5 + $0x5b0] ss:$8 sps:$4 sm:$0xff]  }
 0x137   :  { %2452 = vmatprep.subr.bf16.mxu1 %v3408_v33  ;;  %v3480_v33 = vld [vmem:[#allocation5 + $0x7c4] ss:$8 sps:$4 sm:$0xff]  }
 0x138   :  { %2042 = vmatmul.mubr.bf16.vlgmr.msra.gmra.mrb[4].mxu0 %v573_v62  ;;  %v3486_v62 = vld [vmem:[#allocation5 + $0x7d4] ss:$8 sps:$4 sm:$0xff]  }
 0x139   :  { %2444 = vmatmul.mubr.bf16.vlgmr.msra.gmra.mrb[4].mxu1 %v577_v27  ;;  %2051 = vmatpush1.bf16.msra.mxu0 %v3403_v60  ;;  %v3478_v60 = vld [vmem:[#allocation5 + $0x7c0] ss:$8 sps:$4 sm:$0xff]   ;;  %v3489_v27 = vld [vmem:[#allocation5 + $0x5e4] ss:$8 sps:$4 sm:$0xff]  }
 0x13a   :  { %2082 = vmatprep.mubr.bf16.mxu0 %v576_v36  ;;  %2453 = vmatpush1.bf16.msra.mxu1 %v3406_v15  ;;  %v3481_v15 = vld [vmem:[#allocation5 + $0x5d0] ss:$8 sps:$4 sm:$0xff]   ;;  %v3487_v36 = vld [vmem:[#allocation5 + $0x5e0] ss:$8 sps:$4 sm:$0xff]  }
 0x13b   :  { %2484 = vmatprep.mubr.bf16.mxu1 %v580_v8  ;;  %2052 = vmatprep.subr.bf16.mxu0 %v3411_v31  ;;  %v3492_v31 = vld [vmem:[#allocation5 + $0x7e4] ss:$8 sps:$4 sm:$0xff]   ;;  %v3495_v8 = vld [vmem:[#allocation5 + $0x5f4] ss:$8 sps:$4 sm:$0xff]  }
 0x13c   :  { %2454 = vmatprep.subr.bf16.mxu1 %v3414_v2  ;;  %v3490_v2 = vld [vmem:[#allocation5 + $0x7e0] ss:$8 sps:$4 sm:$0xff]  }
 0x13d   :  { %2053 = vmatpush1.bf16.msra.mxu0 %v3409_v43  ;;  %v3498_v43 = vld [vmem:[#allocation5 + $0x7f4] ss:$8 sps:$4 sm:$0xff]  }
 0x13e   :  { %2455 = vmatpush1.bf16.msra.mxu1 %v3412_v16  ;;  %2054 = vmatprep.subr.bf16.mxu0 %v3417_v52  ;;  %v543_v16 = vmul.f32 0.2, %v3892_v39  ;;  %v547_v52 = vmul.f32 0.2, %v3894_v1 }
 0x13f   :  { %2456 = vmatprep.subr.bf16.mxu1 %v3420_v34  ;;  %v3493_v34 = vld [vmem:[#allocation5 + $0x5f0] ss:$8 sps:$4 sm:$0xff]  }
 0x141   :  { %2055 = vmatpush1.bf16.msra.mxu0 %v3415_v59  ;;  %v3496_v59 = vld [vmem:[#allocation5 + $0x7f0] ss:$8 sps:$4 sm:$0xff]  }
 0x142   :  { %2457 = vmatpush1.bf16.msra.mxu1 %v3418_v44  ;;  %2056 = vmatprep.subr.bf16.mxu0 %v3423_v49  ;;  %v559_v44 = vsel %vm527_vm14, %v3892_v39, %v543_v16  ;;  %v563_v49 = vsel %vm531_vm15, %v3894_v1, %v547_v52  ;;  %v837_v39 = vld [vmem:[%s4021_s4] sm:$0x3]  ;;  %v838_v1 = vld [vmem:[%s4021_s4 + $0x2] sm:$0x3]  ;;  %v840_v16 = vld [vmem:[%s4021_s4 + $0x6] sm:$0x3] }
 0x143   :  { %2458 = vmatprep.subr.bf16.mxu1 %v3426_v50  ;;  %v575_v50 = vpack.c.bf16 %v559_v44, %v559_v44 }
 0x145   :  { %2057 = vmatpush1.bf16.msra.mxu0 %v3421_v51  ;;  %v579_v51 = vpack.c.bf16 %v563_v49, %v563_v49 }
 0x146   :  { %2459 = vmatpush1.bf16.msra.mxu1 %v3424_v29  ;;  %2058 = vmatprep.subr.bf16.mxu0 %v3429_v9  ;;  %v2518_v29 = vld [vmem:[%s4022_s5 + $0x2] sm:$0x3]  ;;  %v2517_v9 = vld [vmem:[%s4022_s5] sm:$0x3] }
 0x147   :  { %2460 = vmatprep.subr.bf16.mxu1 %v3432_v17  ;;  %v2522_v17 = vunpack.c.l.bf16 %v2518_v29 }
 0x149   :  { %2059 = vmatpush1.bf16.msra.mxu0 %v3427_v53  ;;  %v2521_v53 = vunpack.c.l.bf16 %v2517_v9 }
 0x14a   :  { %2461 = vmatpush1.bf16.msra.mxu1 %v3430_v42  ;;  %2060 = vmatprep.subr.bf16.mxu0 %v3435_v54  ;;  %v848_v42 = vrot.slane %v837_v39, %v3719_v30  ;;  %v856_v54 = vrot.slane %v838_v1, %v3719_v30 }
 0x14b   :  { %2462 = vmatprep.subr.bf16.mxu1 %v3438_v18  ;;  %v2540_v18 = vrot.slane %v2522_v17, %v3719_v30 }
 0x14d   :  { %2061 = vmatpush1.bf16.msra.mxu0 %v3433_v55  ;;  %v2544_v55 = vrot.slane %v2522_v17, %v3706_v24 }
 0x14e   :  { %2463 = vmatpush1.bf16.msra.mxu1 %v3436_v46  ;;  %2062 = vmatprep.subr.bf16.mxu0 %v3441_v19  ;;  %v852_v46 = vrot.slane %v837_v39, %v3714_v28  ;;  %v860_v19 = vrot.slane %v838_v1, %v3714_v28 }
 0x14f   :  { %2464 = vmatprep.subr.bf16.mxu1 %v3444_v12  ;;  %v2532_v12 = vrot.slane %v2521_v53, %v3719_v30 }
 0x151   :  { %2063 = vmatpush1.bf16.msra.mxu0 %v3439_v20  ;;  %v2536_v20 = vrot.slane %v2521_v53, %v3706_v24 }
 0x152   :  { %2465 = vmatpush1.bf16.msra.mxu1 %v3442_v57  ;;  %2064 = vmatprep.subr.bf16.mxu0 %v3447_v10 }
 0x153   :  { %2466 = vmatprep.subr.bf16.mxu1 %v3450_v58 }
 0x155   :  { %2065 = vmatpush1.bf16.msra.mxu0 %v3445_v61 }
 0x156   :  { %2467 = vmatpush1.bf16.msra.mxu1 %v3448_v13  ;;  %2066 = vmatprep.subr.bf16.mxu0 %v3453_v11 }
 0x157   :  { %2468 = vmatprep.subr.bf16.mxu1 %v3456_v21  ;;  %v2580_v21 = vrot.slane %v2540_v18, %v3719_v30 }
 0x159   :  { %2067 = vmatpush1.bf16.msra.mxu0 %v3451_v63  ;;  %v2584_v63 = vrot.slane %v2544_v55, %v3719_v30 }
 0x15a   :  { %2469 = vmatpush1.bf16.msra.mxu1 %v3454_v37  ;;  %2068 = vmatprep.subr.bf16.mxu0 %v3459_v3 }
 0x15b   :  { %2470 = vmatprep.subr.bf16.mxu1 %v3462_v4 }
 0x15d   :  { %2069 = vmatpush1.bf16.msra.mxu0 %v3457_v35 }
 0x15e   :  { %2471 = vmatpush1.bf16.msra.mxu1 %v3460_v40  ;;  %2070 = vmatprep.subr.bf16.mxu0 %v3465_v47  ;;  %v2572_v40 = vrot.slane %v2532_v12, %v3719_v30  ;;  %v2576_v47 = vrot.slane %v2536_v20, %v3719_v30 }
 0x15f   :  { %2472 = vmatprep.subr.bf16.mxu1 %v3468_v7 }
 0x161   :  { %2071 = vmatpush1.bf16.msra.mxu0 %v3463_v22 }
 0x162   :  { %2473 = vmatpush1.bf16.msra.mxu1 %v3466_v23  ;;  %2072 = vmatprep.subr.bf16.mxu0 %v3471_v26 }
 0x163   :  { %2474 = vmatprep.subr.bf16.mxu1 %v3474_v32 }
 0x165   :  { %2073 = vmatpush1.bf16.msra.mxu0 %v3469_v41 }
 0x166   :  { %2475 = vmatpush1.bf16.msra.mxu1 %v3472_v48  ;;  %2074 = vmatprep.subr.bf16.mxu0 %v3477_v14 }
 0x167   :  { %2476 = vmatprep.subr.bf16.mxu1 %v3480_v33 }
 0x169   :  { %2075 = vmatpush1.bf16.msra.mxu0 %v3475_v38 }
 0x16a   :  { %2477 = vmatpush1.bf16.msra.mxu1 %v3478_v60  ;;  %2076 = vmatprep.subr.bf16.mxu0 %v3483_v45 }
 0x16b   :  { %2478 = vmatprep.subr.bf16.mxu1 %v3486_v62 }
 0x16d   :  { %2077 = vmatpush1.bf16.msra.mxu0 %v3481_v15 }
 0x16e   :  { %2479 = vmatpush1.bf16.msra.mxu1 %v3484_v0  ;;  %2078 = vmatprep.subr.bf16.mxu0 %v3489_v27 }
 0x16f   :  { %2480 = vmatprep.subr.bf16.mxu1 %v3492_v31  ;;  %v2520_v31 = vld [vmem:[%s4022_s5 + $0x6] sm:$0x3] }
 0x171   :  { %2079 = vmatpush1.bf16.msra.mxu0 %v3487_v36  ;;  %v2519_v36 = vld [vmem:[%s4022_s5 + $0x4] sm:$0x3] }
 0x172   :  { %2481 = vmatpush1.bf16.msra.mxu1 %v3490_v2  ;;  %2080 = vmatprep.subr.bf16.mxu0 %v3495_v8  ;;  %v2524_v2 = vunpack.c.l.bf16 %v2520_v31  ;;  %v839_v8 = vld [vmem:[%s4021_s4 + $0x4] sm:$0x3]  ;;  %s3596_s4 = smov [#allocation7]  }
 0x173   :  { %2482 = vmatprep.subr.bf16.mxu1 %v3498_v43  ;;  %v2523_v43 = vunpack.c.l.bf16 %v2519_v36  ;;  %v864_v52 = vrot.slane %v839_v8, %v3719_v30  ;;  %v868_v44 = vrot.slane %v839_v8, %v3714_v28  ;;  %s2798_s5 = sshll.u32 %s3596_s4, 4  ;;  %s2799_s5 = int_to_ptr.vmem [resolvable:$true] %s2798_s5 }
 0x174   :  { %v2560_v49 = vrot.slane %v2524_v2, %v3706_v24  ;;  %s3559_s0 = scalar_lea.vmem %s2799_s5, 64  ;;  %p3564_p3 = scmp.lt.s32.totalorder %s2799_s5, %s2799_s5 }
 0x175   :  { %2081 = vmatpush1.bf16.msra.mxu0 %v3493_v34  ;;  %v2556_v34 = vrot.slane %v2524_v2, %v3719_v30  ;;  %v2552_v29 = vrot.slane %v2523_v43, %v3706_v24  ;;  %p3560_p2 = scmp.ne.s32.totalorder %s2799_s5, %s3559_s0  ;;  %p3565_p4 = scmp.lt.s32.totalorder %s3559_s0, %s3559_s0 }
 0x176   :  { %2483 = vmatpush1.bf16.msra.mxu1 %v3496_v59  ;;  %v872_v59 = vrot.slane %v840_v16, %v3719_v30 }
 0x177   :  { %v2596_v53 = vrot.slane %v2556_v34, %v3719_v30  ;;  %p3566_p5 = por %p3565_p4, %p3564_p3 }
 0x178   :  { %2083 = vmatmul.mubr.bf16.vlgmr.msra.gmra.mrb[4].mxu0 %v575_v50  ;;  %v2548_v50 = vrot.slane %v2523_v43, %v3719_v30 }
 0x179   :  { %2485 = vmatmul.mubr.bf16.vlgmr.msra.gmra.mrb[4].mxu1 %v579_v51  ;;  %v876_v51 = vrot.slane %v840_v16, %v3714_v28  ;;  %p3567_p6 = pnand %p3566_p5, %p3560_p2 }
 0x1cb   :  { %v1280_v57 = vpop.f32.mrb[0].mxu0  ;;  %v1682_v10 = vpop.f32.mrb[0].mxu1 }
 0x1cc   :  { %v3077_v58 = vadd.f32 %v1280_v57, %v848_v42  ;;  %v3079_v61 = vadd.f32 %v1682_v10, %v856_v54  ;;  %v1282_v13 = vpop.f32.mrb[1].mxu0  ;;  %v1684_v11 = vpop.f32.mrb[1].mxu1 }
 0x1cd   :  { %v3078_v37 = vadd.f32 %v1282_v13, %v852_v46  ;;  %v3080_v3 = vadd.f32 %v1684_v11, %v860_v19  ;;  %v1284_v4 = vpop.f32.mrb[2].mxu0  ;;  %v1686_v35 = vpop.f32.mrb[2].mxu1  ;;  %v2600_v46 = vrot.slane %v2560_v49, %v3719_v30  ;;  %v2588_v19 = vrot.slane %v2548_v50, %v3719_v30 }
 0x1ce   :  { %vm2493_vm0 = vcmp.gt.f32.partialorder %v3077_v58, 0.0  ;;  %v2501_v7 = vmul.f32 0.2, %v3077_v58  ;;  %vm2495_vm1 = vcmp.gt.f32.partialorder %v3079_v61, 0.0  ;;  %v2503_v22 = vmul.f32 0.2, %v3079_v61 }
 0x1cf   :  { %vm2494_vm2 = vcmp.gt.f32.partialorder %v3078_v37, 0.0  ;;  %v2502_v23 = vmul.f32 0.2, %v3078_v37  ;;  %vm2496_vm3 = vcmp.gt.f32.partialorder %v3080_v3, 0.0  ;;  %v2504_v26 = vmul.f32 0.2, %v3080_v3 }
 0x1d0   :  { %v1285_v32 = vpop.f32.mrb[3].mxu0  ;;  %v1687_v41 = vpop.f32.mrb[3].mxu1  ;;  %v2511_v48 = vsel %vm2495_vm1, %v3079_v61, %v2503_v22  ;;  %v2509_v14 = vsel %vm2493_vm0, %v3077_v58, %v2501_v7  ;;  %v2592_v58 = vrot.slane %v2552_v29, %v3719_v30  ;;  %v2766_v29 = vand.u32 127, %v77_v5 }
 0x1d1   :  { %v2512_v33 = vsel %vm2496_vm3, %v3080_v3, %v2504_v26  ;;  %v2603_v38 = vmul.f32 %v2580_v21, %v2511_v48  ;;  %v2510_v60 = vsel %vm2494_vm2, %v3078_v37, %v2502_v23  ;;  %v2601_v45 = vmul.f32 %v2572_v40, %v2509_v14  ;;  %v2695_v30 = vpop.permute.xlu1 %2694 }
 0x1d2   :  { %v2604_v62 = vmul.f32 %v2584_v63, %v2512_v33  ;;  %v2602_v15 = vmul.f32 %v2576_v47, %v2510_v60  ;;  %v2706_v41 = vrot.slane %v3928_v56, %v3706_v24  ;;  %v2713_v14 = vrot.slane %v3928_v56, %v3709_v25 }
 0x1d3   :  { %v2699_v33 = vrot.slane %v3928_v56, %v3714_v28 }
 0x1d4   :  { %v2612_v0 = vadd.f32 %v2604_v62, %v2603_v38  ;;  %v2609_v27 = vadd.f32 %v2602_v15, %v2601_v45 }
 0x1d6   :  { %2613 = vadd.xlane.f32.xlu0 %v2612_v0  ;;  %2610 = vadd.xlane.f32.xlu1 %v2609_v27 }
 0x24b   :  { %v2084_v9 = vpop.f32.mrb[4].mxu0 }
 0x24c   :  { %v3081_v17 = vadd.f32 %v2084_v9, %v864_v52  ;;  %v2486_v39 = vpop.f32.mrb[4].mxu1  ;;  %v2086_v1 = vpop.f32.mrb[5].mxu0 }
 0x24d   :  { %v3083_v42 = vadd.f32 %v2486_v39, %v872_v59  ;;  %v3082_v54 = vadd.f32 %v2086_v1, %v868_v44  ;;  %v2488_v18 = vpop.f32.mrb[5].mxu1  ;;  %v2088_v55 = vpop.f32.mrb[6].mxu0 }
 0x24e   :  { %vm2497_vm4 = vcmp.gt.f32.partialorder %v3081_v17, 0.0  ;;  %v2505_v12 = vmul.f32 0.2, %v3081_v17  ;;  %v3084_v20 = vadd.f32 %v2488_v18, %v876_v51  ;;  %v2490_v57 = vpop.f32.mrb[6].mxu1  ;;  %v2089_v10 = vpop.f32.mrb[7].mxu0 }
 0x24f   :  { %vm2499_vm5 = vcmp.gt.f32.partialorder %v3083_v42, 0.0  ;;  %v2507_v61 = vmul.f32 0.2, %v3083_v42  ;;  %vm2498_vm6 = vcmp.gt.f32.partialorder %v3082_v54, 0.0  ;;  %v2506_v13 = vmul.f32 0.2, %v3082_v54 }
 0x250   :  { %vm2500_vm7 = vcmp.gt.f32.partialorder %v3084_v20, 0.0  ;;  %v2508_v11 = vmul.f32 0.2, %v3084_v20  ;;  %v2491_v21 = vpop.f32.mrb[7].mxu1  ;;  %v2513_v63 = vsel %vm2497_vm4, %v3081_v17, %v2505_v12  ;;  %v2769_v17 = vsub.s32 %v2766_v29, %v3665_v6 }
 0x251   :  { %v2515_v37 = vsel %vm2499_vm5, %v3083_v42, %v2507_v61  ;;  %v2514_v3 = vsel %vm2498_vm6, %v3082_v54, %v2506_v13  ;;  %v2605_v4 = vmul.f32 %v2588_v19, %v2513_v63 }
 0x252   :  { %v2516_v35 = vsel %vm2500_vm7, %v3084_v20, %v2508_v11  ;;  %v2607_v40 = vmul.f32 %v2596_v53, %v2515_v37  ;;  %v2606_v47 = vmul.f32 %v2592_v58, %v2514_v3 }
 0x253   :  { %v2608_v7 = vmul.f32 %v2600_v46, %v2516_v35 }
 0x254   :  { %v2615_v22 = vadd.f32 %v2606_v47, %v2605_v4 }
 0x255   :  { %v2618_v23 = vadd.f32 %v2608_v7, %v2607_v40 }
 0x256   :  { %2616 = vadd.xlane.f32.xlu1 %v2615_v22 }
 0x257   :  { %2619 = vadd.xlane.f32.xlu0 %v2618_v23 }
 0x263   :  { %v2611_v26 = vpop.xlane.xlu1 %2610  ;;  %v2614_v62 = vpop.xlane.xlu0 %2613 }
 0x264   :  { %v2721_v32 = vadd.f32 %v2695_v30, %v2611_v26 }
 0x266   :  { %v3064_v48 = vmul.f32 -1.442695, %v2721_v32 }
 0x267   :  { %2708 = vbcast.lane.b32.xlu1 %v2706_v41, 256 }
 0x268   :  { %3499 = vpow2.f32 %v3064_v48 }
 0x26b   :  { %2715 = vbcast.lane.b32.xlu1 %v2713_v14, 256 }
 0x26d   :  { %2701 = vbcast.lane.b32.xlu0 %v2699_v33, 256 }
 0x272   :  { %v3500_v38 = vpop.eup %3499 }
 0x273   :  { %v2737_v60 = vadd.f32 1.0, %v3500_v38 }
 0x275   :  { %3501 = vrcp.f32 %v2737_v60 }
 0x27f   :  { %v3502_v45 = vpop.eup %3501 }
 0x280   :  { %2754 = vperm.xlu0 %3114, %v3502_v45  }
 0x2e3   :  { %v2617_v15 = vpop.xlane.xlu1 %2616 }
 0x2e4   :  { %v2620_v0 = vpop.xlane.xlu0 %2619 }
 0x2e7   :  { %v2709_v24 = vpop.permute.xlu1 %2708 }
 0x2e8   :  { %v2723_v27 = vadd.f32 %v2709_v24, %v2617_v15  ;;  %v2702_v31 = vpop.permute.xlu0 %2701 }
 0x2e9   :  { %v2722_v36 = vadd.f32 %v2702_v31, %v2614_v62 }
 0x2ea   :  { %v3066_v2 = vmul.f32 -1.442695, %v2723_v27 }
 0x2eb   :  { %v3065_v8 = vmul.f32 -1.442695, %v2722_v36  ;;  %v2716_v25 = vpop.permute.xlu1 %2715 }
 0x2ec   :  { %3503 = vpow2.f32 %v3066_v2  ;;  %v2724_v43 = vadd.f32 %v2716_v25, %v2620_v0 }
 0x2ed   :  { %3505 = vpow2.f32 %v3065_v8 }
 0x2ee   :  { %v3067_v28 = vmul.f32 -1.442695, %v2724_v43 }
 0x2f0   :  { %3507 = vpow2.f32 %v3067_v28 }
 0x2f6   :  { %v3504_v56 = vpop.eup %3503 }
 0x2f7   :  { %v3506_v16 = vpop.eup %3505  ;;  %v2739_v52 = vadd.f32 1.0, %v3504_v56 }
 0x2f8   :  { %v2738_v34 = vadd.f32 1.0, %v3506_v16 }
 0x2f9   :  { %3509 = vrcp.f32 %v2739_v52 }
 0x2fa   :  { %v3508_v59 = vpop.eup %3507  ;;  %3511 = vrcp.f32 %v2738_v34 }
 0x2fb   :  { %v2740_v44 = vadd.f32 1.0, %v3508_v59 }
 0x2fd   :  { %3513 = vrcp.f32 %v2740_v44 }
 0x2ff   :  { %v2755_v9 = vpop.permute.xlu0 %2754 }
 0x300   :  { %v2770_v53 = vrot.slane %v2755_v9, %v2769_v17 }
 0x303   :  { %v3510_v49 = vpop.eup %3509 }
 0x304   :  { %v3512_v50 = vpop.eup %3511  ;;  %2760 = vperm.xlu0 %3114, %v3510_v49  }
 0x305   :  { %2757 = vperm.xlu1 %3113, %v3512_v50  }
 0x307   :  { %v3514_v51 = vpop.eup %3513 }
 0x309   :  { %2763 = vperm.xlu1 %3113, %v3514_v51  }
 0x383   :  { %v2761_v39 = vpop.permute.xlu0 %2760 }
 0x384   :  { %v2758_v1 = vpop.permute.xlu1 %2757  ;;  %v2778_v54 = vrot.slane %v2761_v39, %v2769_v17 }
 0x385   :  { %v2774_v42 = vrot.slane %v2758_v1, %v2769_v17 }
 0x387   :  { %v2784_v18 = vsel %vm2783_vm8, %v2774_v42, %v2770_v53 }
 0x388   :  { %v2764_v55 = vpop.permute.xlu1 %2763  ;;  %v2786_v19 = vsel %vm2785_vm9, %v2778_v54, %v2784_v18 }
 0x389   :  { %v2782_v46 = vrot.slane %v2764_v55, %v2769_v17 }
 0x38b   :  { %v2788_v5 = vsel %vm2787_vm10, %v2782_v46, %v2786_v19 }
 0x38c   :  { %2791 = vst.msk [vmem:[#allocation7] sm:$0xf] %vm2790_vm11, %v2788_v5 }
 0x38d   :  { %3570 = shalt.err (!%p3567_p6)
}
 0x38e   :  { %s3571_s8 = scalar_lea.hbm %s4024_s7, 64 }
 0x38f   :  { %p3572_p7 = scmp.ne.s32.totalorder %s4024_s7, %s3571_s8  ;;  %p3575_p8 = scmp.lt.u32.totalorder %s3571_s8, %s4024_s7 }
 0x391   :  { %p3577_p9 = pnand %p3575_p8, %p3572_p7 }
 0x393   :  { %3580 = shalt.err (!%p3577_p9)
}
 0x394   :  { %2801 = dma.vmem_to_hbm [thread:$0]  %s2799_s5, 64, %s4024_s7, [#allocation4]  }
 0x395   :  { %3585 = dma.done.wait [#allocation4], 64  }
 0x396   :  { %3586 = vsyncadd [#allocation4], 4294967232 }
 0x397   :  { %2805 = vsyncpa [#allocation3], 1 }
 0x398   :  { %2806 = vsyncpa [#allocation6], 1 }
 0x399   :  { %2807 = vsyncpa [#allocation4], 1 }

</bundles_post_ra>
